<compile_context>
chip_gen: v6e
topology: v6e:2x2x1
jax: 0.10.0
libtpu: 0.0.40
codegen_flags: <defaults>
</compile_context>

<pallas_src>
import functools
import numpy as np
import jax
import jax.numpy as jnp
from jax.experimental import pallas as pl
from jax.experimental.pallas import tpu as pltpu


# ----------------------- phase decomposition tables --------------------------
# ConvTranspose2d(k=4, s=2, p=1): output pixel (2p+r, 2q+s) receives
#   sum_{dh in D[r], dw in D[s], cin} x[p+dh, q+dw, cin] * w[cin, co, KH[r][dh], KW[s][dw]]
_KMAP = {0: {0: 1, -1: 3}, 1: {0: 2, 1: 0}}   # phase bit -> {shift -> kernel tap}
_DD = {0: (0, -1), 1: (0, 1)}                 # phase bit -> input shift choices

# _PHASES[r*2+s] = list of 4 (dh, dw, kh, kw); order shared between the weight
# table builder (K layout) and the in-kernel im2col scratch fill.
_PHASES = []
for _r in (0, 1):
    for _s in (0, 1):
        _PHASES.append([(dh, dw, _KMAP[_r][dh], _KMAP[_s][dw])
                        for dh in _DD[_r] for dw in _DD[_s]])


def _pick_row_tile(H):
    # Output row tile: multiple of 8 (sublane) dividing H, >= 2 tiles if possible
    # (keeps both v7x TensorCores busy even for N=1).
    for cand in (32, 16, 8):
        if H % cand == 0 and H // cand >= 2:
            return cand
    for cand in (32, 16, 8):
        if H % cand == 0:
            return cand
    return H


def _pick_channel_tile(C):
    # Channel tile is the lane dim of several blocks: 128-aligned or full C.
    return 128 if C % 128 == 0 else C


def _vmem_limit(n_bytes):
    # Explicit scoped-VMEM cap: 2x headroom over the resident blocks, clamped to
    # [8 MiB, 64 MiB] so it is valid on every generation (v7x physical = 64 MiB).
    return int(min(64 * 2**20, max(2 * n_bytes, 8 * 2**20)))


# ------------- Kernel A: InstanceNorm + LeakyReLU + pad -> NHWC --------------

def _norm_lrelu_pad_kernel(x_ref, o_ref, *, H, W, normalize, eps, slope):
    # x_ref: (1, tc, H*W)      one image's channel tile (rows = channels, NCHW view)
    # o_ref: (1, H+2, W+2, tc) zero-padded NHWC tile (conv-ready layout)
    x = x_ref[0].astype(jnp.float32)                       # (tc, H*W), f32 VPU math
    if normalize:                                          # InstanceNorm2d(affine=False)
        inv_n = 1.0 / float(H * W)
        mean = jnp.sum(x, axis=1, keepdims=True) * inv_n   # single fused pass:
        ex2 = jnp.sum(x * x, axis=1, keepdims=True) * inv_n  # sum & sum-of-squares
        var = ex2 - mean * mean                            # biased var (PyTorch)
        x = (x - mean) * jax.lax.rsqrt(var + eps)
    x = jnp.where(x >= 0.0, x, slope * x)                  # LeakyReLU(0.2)
    tc = x.shape[0]
    y = x.T.reshape(H, W, tc).astype(o_ref.dtype)          # channel-minor NHWC slab

    # Zero only the four border slabs (no full-tile zero-init + interior rewrite).
    zrow = jnp.zeros((1, W + 2, tc), o_ref.dtype)
    zcol = jnp.zeros((H + 2, 1, tc), o_ref.dtype)
    o_ref[0, 0:1, :, :] = zrow
    o_ref[0, H + 1:H + 2, :, :] = zrow
    o_ref[0, :, 0:1, :] = zcol
    o_ref[0, :, W + 1:W + 2, :] = zcol
    o_ref[0, 1:H + 1, 1:W + 1, :] = y                      # interior (conv padding = border)


def _norm_lrelu_pad(x, normalize, out_dtype):
    N, C, H, W = x.shape
    tc = _pick_channel_tile(C)
    x3 = x.reshape(N, C, H * W)                            # free reshape of NCHW
    kern = functools.partial(_norm_lrelu_pad_kernel, H=H, W=W,
                             normalize=normalize, eps=1e-5, slope=0.2)
    in_b = jnp.dtype(x.dtype).itemsize
    out_b = jnp.dtype(out_dtype).itemsize
    need = 2 * tc * H * W * in_b + 2 * (H + 2) * (W + 2) * tc * out_b
    return pl.pallas_call(
        kern,
        out_shape=jax.ShapeDtypeStruct((N, H + 2, W + 2, C), out_dtype),
        grid=(N, C // tc),
        in_specs=[pl.BlockSpec((1, tc, H * W), lambda n, c: (n, c, 0))],
        out_specs=pl.BlockSpec((1, H + 2, W + 2, tc), lambda n, c: (n, 0, 0, c)),
        compiler_params=pltpu.CompilerParams(
            dimension_semantics=("parallel", "parallel"),
            vmem_limit_bytes=_vmem_limit(need)),
    )(x3)


# ------------- Kernel B: fused im2col + ConvTranspose2d matmuls --------------

def _build_weight_table(w, dtype):
    # w: (Cin, Cout, 4, 4) PyTorch ConvTranspose2d weight layout (jit-safe build).
    # Per phase, the 4 taps are concatenated along the Cin axis -> (4*Cin, Cout),
    # matching the K layout of the in-kernel im2col scratch (tap-major, cin-minor).
    slabs = [jnp.concatenate([w[:, :, kh, kw] for (_, _, kh, kw) in entries], axis=0)
             for entries in _PHASES]
    return jnp.stack(slabs, axis=0).astype(dtype)          # (4, 4*Cin, Cout)


def _deconv_kernel(xp_ref, w_ref, o_ref, lhs_ref, *, th, W, Cin, Cout):
    # xp_ref : (1, H+2, W+2, Cin)    padded NHWC activation.  Block index is
    #                                constant across row tiles -> one DMA per image.
    # w_ref  : (4, 4*Cin, Cout)      per-phase K-concatenated weights (resident).
    # o_ref  : (1, th, 2, W, 2*Cout) phase-packed output row tile (plain stores).
    # lhs_ref: (th*W, 4*Cin)         VMEM im2col scratch (never materialized in HBM).
    t = pl.program_id(1)                                   # output row tile
    p0 = pl.multiple_of(t * th, th)
    for p_idx, entries in enumerate(_PHASES):              # 4 output phases (r, s)
        r, s = divmod(p_idx, 2)
        # Pack the 4 tap slices along the channel axis of the scratch -> K = 4*Cin.
        # Slicing the ref directly per tap keeps vreg pressure low (no whole-window
        # value load + sublane-shifted re-slices).
        for j, (dh, dw, _, _) in enumerate(entries):
            xs = xp_ref[0, pl.ds(p0 + 1 + dh, th), pl.ds(1 + dw, W), :]  # (th, W, Cin)
            lhs_ref[:, j * Cin:(j + 1) * Cin] = xs.reshape(th * W, Cin)
        acc = jnp.dot(lhs_ref[...], w_ref[p_idx],
                      preferred_element_type=jnp.float32)  # (th*W, Cout), K = 4*Cin
        # Full reduction happened in the dot -> single store (no zero-init / RMW).
        # For Cout >= 128 these lane slices are 128-aligned dense stores.
        o_ref[0, :, r, :, s * Cout:(s + 1) * Cout] = (
            acc.reshape(th, W, Cout).astype(o_ref.dtype))


def _conv_transpose_4x2x1(xp, w_tab, Cout, out_dtype):
    # xp: (N, H+2, W+2, Cin) padded NHWC; w_tab: (4, 4*Cin, Cout) -> (N, Cout, 2H, 2W)
    N, Hp2, Wp2, Cin = xp.shape
    H, W = Hp2 - 2, Wp2 - 2
    th = _pick_row_tile(H)
    kern = functools.partial(_deconv_kernel, th=th, W=W, Cin=Cin, Cout=Cout)
    a_b = jnp.dtype(xp.dtype).itemsize
    o_b = jnp.dtype(out_dtype).itemsize
    need = (2 * Hp2 * Wp2 * Cin * a_b            # activation blocks
            + 2 * 4 * 4 * Cin * Cout * a_b       # weight blocks
            + 2 * th * 2 * W * 2 * Cout * o_b    # output tiles
            + th * W * 4 * Cin * a_b)            # im2col scratch
    out = pl.pallas_call(
        kern,
        out_shape=jax.ShapeDtypeStruct((N, H, 2, W, 2 * Cout), out_dtype),
        grid=(N, H // th),
        in_specs=[
            # Activation block index depends only on n -> fetched once per image.
            pl.BlockSpec((1, Hp2, Wp2, Cin), lambda n, t: (n, 0, 0, 0)),
            pl.BlockSpec((4, 4 * Cin, Cout), lambda n, t: (0, 0, 0)),
        ],
        out_specs=pl.BlockSpec((1, th, 2, W, 2 * Cout),
                               lambda n, t: (n, t, 0, 0, 0)),
        scratch_shapes=[pltpu.VMEM((th * W, 4 * Cin), xp.dtype)],
        compiler_params=pltpu.CompilerParams(
            dimension_semantics=("parallel", "parallel"),
            vmem_limit_bytes=_vmem_limit(need)),
    )(xp, w_tab)
    # (N, H, 2, W, 2*Cout) == [n, p, r, q, s*Cout+co] -> NHWC is a free reshape;
    # a single (compute_dtype) XLA transpose returns the PyTorch NCHW layout.
    y_nhwc = out.reshape(N, 2 * H, 2 * W, Cout)
    return jnp.transpose(y_nhwc, (0, 3, 1, 2))


# ------------------------------- Module forward ------------------------------

def _upsample_forward(x, w, normalize=True, compute_dtype=jnp.bfloat16):
    # x: (N, Cin, H, W), w: (Cin, Cout, 4, 4) -> (N, Cout, 2H, 2W)
    Cout = w.shape[1]
    xp = _norm_lrelu_pad(x, normalize, compute_dtype)      # fused norm+lrelu+pad, NHWC
    w_tab = _build_weight_table(w, compute_dtype)
    return _conv_transpose_4x2x1(xp, w_tab, Cout, compute_dtype)


upsample_forward = jax.jit(_upsample_forward,
                           static_argnames=("normalize", "compute_dtype"))


# --------------------------------- Reference ---------------------------------

def _reference(x, w):
    x = x.astype(jnp.float32)
    mean = jnp.mean(x, axis=(2, 3), keepdims=True)
    var = jnp.mean((x - mean) ** 2, axis=(2, 3), keepdims=True)
    h = (x - mean) * jax.lax.rsqrt(var + 1e-5)
    h = jnp.where(h >= 0.0, h, 0.2 * h)
    # ConvTranspose2d(k=4,s=2,p=1) == conv(lhs_dilation=2, pad=2, flipped kernel)
    w_conv = jnp.flip(w, axis=(2, 3)).transpose(1, 0, 2, 3)  # (Cout, Cin, 4, 4)
    return jax.lax.conv_general_dilated(
        h, w_conv, window_strides=(1, 1), padding=((2, 2), (2, 2)),
        lhs_dilation=(2, 2), dimension_numbers=("NCHW", "OIHW", "NCHW"))


# ----------------------------------- Main ------------------------------------

if __name__ == "__main__":
    N, C_in, C_out, H, W = 2, 4, 8, 16, 16
    key = jax.random.PRNGKey(0)
    kx, kw = jax.random.split(key)
    x = jax.random.normal(kx, (N, C_in, H, W), dtype=jnp.float32)
    # PyTorch ConvTranspose2d weight layout: (Cin, Cout, kH, kW)
    w = 0.1 * jax.random.normal(kw, (C_in, C_out, 4, 4), dtype=jnp.float32)

    y_ref = jax.block_until_ready(_reference(x, w))

    # Exact path (f32 MXU inputs): validates the fused kernel algorithm tightly.
    y32 = jax.block_until_ready(
        upsample_forward(x, w, normalize=True, compute_dtype=jnp.float32))
    assert y32.shape == (N, C_out, 2 * H, 2 * W), y32.shape
    np.testing.assert_allclose(np.asarray(y32, dtype=np.float32),
                               np.asarray(y_ref), rtol=1e-4, atol=1e-4)

    # Fast path (bf16 MXU inputs + bf16 writeback, f32 accumulation).
    ybf = jax.block_until_ready(
        upsample_forward(x, w, normalize=True, compute_dtype=jnp.bfloat16))
    assert ybf.shape == (N, C_out, 2 * H, 2 * W), ybf.shape
    np.testing.assert_allclose(np.asarray(ybf, dtype=np.float32),
                               np.asarray(y_ref), rtol=2e-2, atol=3e-2)

    print("KERNEL_OK")
</pallas_src>

<mosaic_0001>
module attributes {stable_mosaic.version = 11 : i64} {
  func.func @_norm_lrelu_pad_kernel(%arg0: i32, %arg1: i32, %arg2: memref<1x4x256xf32, #tpu.memory_space<vmem>>, %arg3: memref<1x18x18x4xf32, #tpu.memory_space<vmem>>) attributes {dimension_semantics = [#tpu.dimension_semantics<parallel>, #tpu.dimension_semantics<parallel>], iteration_bounds = array<i64: 2, 1>, scalar_prefetch = 0 : i64, scratch_operands = 0 : i64, tpu.core_type = #tpu.core_type<tc>, window_params = [{transform_indices = @transform_0, window_bounds = array<i64: 1, 4, 256>}, {transform_indices = @transform_1, window_bounds = array<i64: 1, 18, 18, 4>}]} {
    %c0 = arith.constant 0 : index
    %c0_0 = arith.constant 0 : index
    %c0_1 = arith.constant 0 : index
    %0 = vector.load %arg2[%c0, %c0_0, %c0_1] : memref<1x4x256xf32, #tpu.memory_space<vmem>>, vector<1x4x256xf32>
    %1 = vector.shape_cast %0 : vector<1x4x256xf32> to vector<4x256xf32>
    %cst = arith.constant dense<0.000000e+00> : vector<4xf32>
    %2 = vector.multi_reduction <add>, %1, %cst [1] : vector<4x256xf32> to vector<4xf32>
    %3 = vector.shape_cast %2 : vector<4xf32> to vector<4x1xf32>
    %cst_2 = arith.constant 3.906250e-03 : f32
    %4 = vector.broadcast %cst_2 : f32 to vector<4x1xf32>
    %5 = arith.mulf %3, %4 : vector<4x1xf32>
    %6 = arith.mulf %1, %1 : vector<4x256xf32>
    %cst_3 = arith.constant dense<0.000000e+00> : vector<4xf32>
    %7 = vector.multi_reduction <add>, %6, %cst_3 [1] : vector<4x256xf32> to vector<4xf32>
    %8 = vector.shape_cast %7 : vector<4xf32> to vector<4x1xf32>
    %cst_4 = arith.constant 3.906250e-03 : f32
    %9 = vector.broadcast %cst_4 : f32 to vector<4x1xf32>
    %10 = arith.mulf %8, %9 : vector<4x1xf32>
    %11 = arith.mulf %5, %5 : vector<4x1xf32>
    %12 = arith.subf %10, %11 : vector<4x1xf32>
    %13 = vector.broadcast %5 : vector<4x1xf32> to vector<4x256xf32>
    %14 = arith.subf %1, %13 : vector<4x256xf32>
    %cst_5 = arith.constant 9.99999974E-6 : f32
    %15 = vector.broadcast %cst_5 : f32 to vector<4x1xf32>
    %16 = arith.addf %12, %15 : vector<4x1xf32>
    %17 = math.rsqrt %16 : vector<4x1xf32>
    %18 = vector.broadcast %17 : vector<4x1xf32> to vector<4x256xf32>
    %19 = arith.mulf %14, %18 : vector<4x256xf32>
    %cst_6 = arith.constant 0.000000e+00 : f32
    %20 = vector.broadcast %cst_6 : f32 to vector<4x256xf32>
    %21 = arith.cmpf oge, %19, %20 : vector<4x256xf32>
    %cst_7 = arith.constant 2.000000e-01 : f32
    %22 = vector.broadcast %cst_7 : f32 to vector<4x256xf32>
    %23 = arith.mulf %22, %19 : vector<4x256xf32>
    %24 = arith.select %21, %19, %23 : vector<4x256xi1>, vector<4x256xf32>
    %25 = tpu.transpose %24, [1, 0] : vector<4x256xf32> -> vector<256x4xf32>
    %26 = vector.shape_cast %25 : vector<256x4xf32> to vector<16x16x4xf32>
    %cst_8 = arith.constant 0.000000e+00 : f32
    %27 = vector.broadcast %cst_8 : f32 to vector<1x18x4xf32>
    %cst_9 = arith.constant 0.000000e+00 : f32
    %28 = vector.broadcast %cst_9 : f32 to vector<18x1x4xf32>
    %c0_10 = arith.constant 0 : index
    %c0_11 = arith.constant 0 : index
    %c0_12 = arith.constant 0 : index
    %c0_13 = arith.constant 0 : index
    %29 = vector.load %arg3[%c0_10, %c0_11, %c0_12, %c0_13] : memref<1x18x18x4xf32, #tpu.memory_space<vmem>>, vector<1x1x18x4xf32>
    %30 = vector.shape_cast %29 : vector<1x1x18x4xf32> to vector<1x18x4xf32>
    %31 = vector.shape_cast %27 : vector<1x18x4xf32> to vector<1x1x18x4xf32>
    tpu.vector_store %arg3[%c0_10, %c0_11, %c0_12, %c0_13], %31 {strides = array<i32>} : memref<1x18x18x4xf32, #tpu.memory_space<vmem>>, vector<1x1x18x4xf32>,
    %c0_14 = arith.constant 0 : index
    %c17 = arith.constant 17 : index
    %c0_15 = arith.constant 0 : index
    %c0_16 = arith.constant 0 : index
    %32 = vector.load %arg3[%c0_14, %c17, %c0_15, %c0_16] : memref<1x18x18x4xf32, #tpu.memory_space<vmem>>, vector<1x1x18x4xf32>
    %33 = vector.shape_cast %32 : vector<1x1x18x4xf32> to vector<1x18x4xf32>
    %34 = vector.shape_cast %27 : vector<1x18x4xf32> to vector<1x1x18x4xf32>
    tpu.vector_store %arg3[%c0_14, %c17, %c0_15, %c0_16], %34 {strides = array<i32>} : memref<1x18x18x4xf32, #tpu.memory_space<vmem>>, vector<1x1x18x4xf32>,
    %c0_17 = arith.constant 0 : index
    %c0_18 = arith.constant 0 : index
    %c0_19 = arith.constant 0 : index
    %c0_20 = arith.constant 0 : index
    %35 = vector.load %arg3[%c0_17, %c0_18, %c0_19, %c0_20] : memref<1x18x18x4xf32, #tpu.memory_space<vmem>>, vector<1x18x1x4xf32>
    %36 = vector.shape_cast %35 : vector<1x18x1x4xf32> to vector<18x1x4xf32>
    %37 = vector.shape_cast %28 : vector<18x1x4xf32> to vector<1x18x1x4xf32>
    tpu.vector_store %arg3[%c0_17, %c0_18, %c0_19, %c0_20], %37 {strides = array<i32>} : memref<1x18x18x4xf32, #tpu.memory_space<vmem>>, vector<1x18x1x4xf32>,
    %c0_21 = arith.constant 0 : index
    %c0_22 = arith.constant 0 : index
    %c17_23 = arith.constant 17 : index
    %c0_24 = arith.constant 0 : index
    %38 = vector.load %arg3[%c0_21, %c0_22, %c17_23, %c0_24] : memref<1x18x18x4xf32, #tpu.memory_space<vmem>>, vector<1x18x1x4xf32>
    %39 = vector.shape_cast %38 : vector<1x18x1x4xf32> to vector<18x1x4xf32>
    %40 = vector.shape_cast %28 : vector<18x1x4xf32> to vector<1x18x1x4xf32>
    tpu.vector_store %arg3[%c0_21, %c0_22, %c17_23, %c0_24], %40 {strides = array<i32>} : memref<1x18x18x4xf32, #tpu.memory_space<vmem>>, vector<1x18x1x4xf32>,
    %c0_25 = arith.constant 0 : index
    %c1 = arith.constant 1 : index
    %c1_26 = arith.constant 1 : index
    %c0_27 = arith.constant 0 : index
    %41 = vector.load %arg3[%c0_25, %c1, %c1_26, %c0_27] : memref<1x18x18x4xf32, #tpu.memory_space<vmem>>, vector<1x16x16x4xf32>
    %42 = vector.shape_cast %41 : vector<1x16x16x4xf32> to vector<16x16x4xf32>
    %43 = vector.shape_cast %26 : vector<16x16x4xf32> to vector<1x16x16x4xf32>
    tpu.vector_store %arg3[%c0_25, %c1, %c1_26, %c0_27], %43 {strides = array<i32>} : memref<1x18x18x4xf32, #tpu.memory_space<vmem>>, vector<1x16x16x4xf32>,
    return
  }
  func.func @transform_0(%arg0: i32, %arg1: i32) -> (i32, i32, i32) {
    %c0_i32 = arith.constant 0 : i32
    %c0_i32_0 = arith.constant 0 : i32
    return %arg0, %arg1, %c0_i32 : i32, i32, i32
  }
  func.func @transform_1(%arg0: i32, %arg1: i32) -> (i32, i32, i32, i32) {
    %c0_i32 = arith.constant 0 : i32
    %c0_i32_0 = arith.constant 0 : i32
    %c0_i32_1 = arith.constant 0 : i32
    return %arg0, %c0_i32, %c0_i32_0, %arg1 : i32, i32, i32, i32
  }
}

module attributes {stable_mosaic.version = 11 : i64} {
  func.func @_deconv_kernel(%arg0: i32, %arg1: i32, %arg2: memref<1x18x18x4xf32, #tpu.memory_space<vmem>>, %arg3: memref<4x16x8xf32, #tpu.memory_space<vmem>>, %arg4: memref<1x8x2x16x16xf32, #tpu.memory_space<vmem>>, %arg5: memref<128x16xf32, #tpu.memory_space<vmem>>) attributes {dimension_semantics = [#tpu.dimension_semantics<parallel>, #tpu.dimension_semantics<parallel>], iteration_bounds = array<i64: 2, 2>, scalar_prefetch = 0 : i64, scratch_operands = 1 : i64, tpu.core_type = #tpu.core_type<tc>, window_params = [{transform_indices = @transform_0, window_bounds = array<i64: 1, 18, 18, 4>}, {pipeline_mode = #tpu.pipeline_mode<synchronous>, transform_indices = @transform_1, window_bounds = array<i64: 4, 16, 8>}, {transform_indices = @transform_2, window_bounds = array<i64: 1, 8, 2, 16, 16>}]} {
    %c8_i32 = arith.constant 8 : i32
    %0 = arith.muli %arg1, %c8_i32 : i32
    %1 = tpu.assume_multiple %0, 8 : i32
    %c1_i32 = arith.constant 1 : i32
    %2 = arith.addi %1, %c1_i32 : i32
    %c0_i32 = arith.constant 0 : i32
    %3 = arith.addi %2, %c0_i32 : i32
    %c0 = arith.constant 0 : index
    %4 = arith.index_cast %3 : i32 to index
    %c1 = arith.constant 1 : index
    %c0_0 = arith.constant 0 : index
    %5 = vector.load %arg2[%c0, %4, %c1, %c0_0] : memref<1x18x18x4xf32, #tpu.memory_space<vmem>>, vector<1x8x16x4xf32>
    %6 = vector.shape_cast %5 : vector<1x8x16x4xf32> to vector<8x16x4xf32>
    %7 = vector.shape_cast %6 : vector<8x16x4xf32> to vector<128x4xf32>
    %c0_1 = arith.constant 0 : index
    %c0_2 = arith.constant 0 : index
    %8 = vector.load %arg5[%c0_1, %c0_2] : memref<128x16xf32, #tpu.memory_space<vmem>>, vector<128x4xf32>
    tpu.vector_store %arg5[%c0_1, %c0_2], %7 {strides = array<i32>} : memref<128x16xf32, #tpu.memory_space<vmem>>, vector<128x4xf32>,
    %c1_i32_3 = arith.constant 1 : i32
    %9 = arith.addi %1, %c1_i32_3 : i32
    %c0_i32_4 = arith.constant 0 : i32
    %10 = arith.addi %9, %c0_i32_4 : i32
    %c0_5 = arith.constant 0 : index
    %11 = arith.index_cast %10 : i32 to index
    %c0_6 = arith.constant 0 : index
    %c0_7 = arith.constant 0 : index
    %12 = vector.load %arg2[%c0_5, %11, %c0_6, %c0_7] : memref<1x18x18x4xf32, #tpu.memory_space<vmem>>, vector<1x8x16x4xf32>
    %13 = vector.shape_cast %12 : vector<1x8x16x4xf32> to vector<8x16x4xf32>
    %14 = vector.shape_cast %13 : vector<8x16x4xf32> to vector<128x4xf32>
    %c0_8 = arith.constant 0 : index
    %c4 = arith.constant 4 : index
    %15 = vector.load %arg5[%c0_8, %c4] : memref<128x16xf32, #tpu.memory_space<vmem>>, vector<128x4xf32>
    tpu.vector_store %arg5[%c0_8, %c4], %14 {strides = array<i32>} : memref<128x16xf32, #tpu.memory_space<vmem>>, vector<128x4xf32>,
    %c1_i32_9 = arith.constant 1 : i32
    %16 = arith.addi %1, %c1_i32_9 : i32
    %c-1_i32 = arith.constant -1 : i32
    %17 = arith.addi %16, %c-1_i32 : i32
    %c0_10 = arith.constant 0 : index
    %18 = arith.index_cast %17 : i32 to index
    %c1_11 = arith.constant 1 : index
    %c0_12 = arith.constant 0 : index
    %19 = vector.load %arg2[%c0_10, %18, %c1_11, %c0_12] : memref<1x18x18x4xf32, #tpu.memory_space<vmem>>, vector<1x8x16x4xf32>
    %20 = vector.shape_cast %19 : vector<1x8x16x4xf32> to vector<8x16x4xf32>
    %21 = vector.shape_cast %20 : vector<8x16x4xf32> to vector<128x4xf32>
    %c0_13 = arith.constant 0 : index
    %c8 = arith.constant 8 : index
    %22 = vector.load %arg5[%c0_13, %c8] : memref<128x16xf32, #tpu.memory_space<vmem>>, vector<128x4xf32>
    tpu.vector_store %arg5[%c0_13, %c8], %21 {strides = array<i32>} : memref<128x16xf32, #tpu.memory_space<vmem>>, vector<128x4xf32>,
    %c1_i32_14 = arith.constant 1 : i32
    %23 = arith.addi %1, %c1_i32_14 : i32
    %c-1_i32_15 = arith.constant -1 : i32
    %24 = arith.addi %23, %c-1_i32_15 : i32
    %c0_16 = arith.constant 0 : index
    %25 = arith.index_cast %24 : i32 to index
    %c0_17 = arith.constant 0 : index
    %c0_18 = arith.constant 0 : index
    %26 = vector.load %arg2[%c0_16, %25, %c0_17, %c0_18] : memref<1x18x18x4xf32, #tpu.memory_space<vmem>>, vector<1x8x16x4xf32>
    %27 = vector.shape_cast %26 : vector<1x8x16x4xf32> to vector<8x16x4xf32>
    %28 = vector.shape_cast %27 : vector<8x16x4xf32> to vector<128x4xf32>
    %c0_19 = arith.constant 0 : index
    %c12 = arith.constant 12 : index
    %29 = vector.load %arg5[%c0_19, %c12] : memref<128x16xf32, #tpu.memory_space<vmem>>, vector<128x4xf32>
    tpu.vector_store %arg5[%c0_19, %c12], %28 {strides = array<i32>} : memref<128x16xf32, #tpu.memory_space<vmem>>, vector<128x4xf32>,
    %c0_20 = arith.constant 0 : index
    %c0_21 = arith.constant 0 : index
    %30 = vector.load %arg5[%c0_20, %c0_21] : memref<128x16xf32, #tpu.memory_space<vmem>>, vector<128x16xf32>
    %c0_22 = arith.constant 0 : index
    %c0_23 = arith.constant 0 : index
    %c0_24 = arith.constant 0 : index
    %31 = vector.load %arg3[%c0_22, %c0_23, %c0_24] : memref<4x16x8xf32, #tpu.memory_space<vmem>>, vector<1x16x8xf32>
    %32 = vector.shape_cast %31 : vector<1x16x8xf32> to vector<16x8xf32>
    %cst = arith.constant dense<0.000000e+00> : vector<128x8xf32>
    %33 = tpu.matmul %30, %32, %cst {dimension_numbers = #tpu.dot_dimension_numbers<[1], [0], [0], [1], [0, 0, 1, 1], [], []>} : vector<128x16xf32>, vector<16x8xf32>, vector<128x8xf32> -> vector<128x8xf32>
    %34 = vector.shape_cast %33 : vector<128x8xf32> to vector<8x16x8xf32>
    %c0_25 = arith.constant 0 : index
    %c0_26 = arith.constant 0 : index
    %c0_27 = arith.constant 0 : index
    %c0_28 = arith.constant 0 : index
    %c0_29 = arith.constant 0 : index
    %35 = vector.load %arg4[%c0_25, %c0_26, %c0_27, %c0_28, %c0_29] : memref<1x8x2x16x16xf32, #tpu.memory_space<vmem>>, vector<1x8x1x16x8xf32>
    %36 = vector.shape_cast %35 : vector<1x8x1x16x8xf32> to vector<8x16x8xf32>
    %37 = vector.shape_cast %34 : vector<8x16x8xf32> to vector<1x8x1x16x8xf32>
    tpu.vector_store %arg4[%c0_25, %c0_26, %c0_27, %c0_28, %c0_29], %37 {strides = array<i32>} : memref<1x8x2x16x16xf32, #tpu.memory_space<vmem>>, vector<1x8x1x16x8xf32>,
    %c1_i32_30 = arith.constant 1 : i32
    %38 = arith.addi %1, %c1_i32_30 : i32
    %c0_i32_31 = arith.constant 0 : i32
    %39 = arith.addi %38, %c0_i32_31 : i32
    %c0_32 = arith.constant 0 : index
    %40 = arith.index_cast %39 : i32 to index
    %c1_33 = arith.constant 1 : index
    %c0_34 = arith.constant 0 : index
    %41 = vector.load %arg2[%c0_32, %40, %c1_33, %c0_34] : memref<1x18x18x4xf32, #tpu.memory_space<vmem>>, vector<1x8x16x4xf32>
    %42 = vector.shape_cast %41 : vector<1x8x16x4xf32> to vector<8x16x4xf32>
    %43 = vector.shape_cast %42 : vector<8x16x4xf32> to vector<128x4xf32>
    %c0_35 = arith.constant 0 : index
    %c0_36 = arith.constant 0 : index
    %44 = vector.load %arg5[%c0_35, %c0_36] : memref<128x16xf32, #tpu.memory_space<vmem>>, vector<128x4xf32>
    tpu.vector_store %arg5[%c0_35, %c0_36], %43 {strides = array<i32>} : memref<128x16xf32, #tpu.memory_space<vmem>>, vector<128x4xf32>,
    %c1_i32_37 = arith.constant 1 : i32
    %45 = arith.addi %1, %c1_i32_37 : i32
    %c0_i32_38 = arith.constant 0 : i32
    %46 = arith.addi %45, %c0_i32_38 : i32
    %c0_39 = arith.constant 0 : index
    %47 = arith.index_cast %46 : i32 to index
    %c2 = arith.constant 2 : index
    %c0_40 = arith.constant 0 : index
    %48 = vector.load %arg2[%c0_39, %47, %c2, %c0_40] : memref<1x18x18x4xf32, #tpu.memory_space<vmem>>, vector<1x8x16x4xf32>
    %49 = vector.shape_cast %48 : vector<1x8x16x4xf32> to vector<8x16x4xf32>
    %50 = vector.shape_cast %49 : vector<8x16x4xf32> to vector<128x4xf32>
    %c0_41 = arith.constant 0 : index
    %c4_42 = arith.constant 4 : index
    %51 = vector.load %arg5[%c0_41, %c4_42] : memref<128x16xf32, #tpu.memory_space<vmem>>, vector<128x4xf32>
    tpu.vector_store %arg5[%c0_41, %c4_42], %50 {strides = array<i32>} : memref<128x16xf32, #tpu.memory_space<vmem>>, vector<128x4xf32>,
    %c1_i32_43 = arith.constant 1 : i32
    %52 = arith.addi %1, %c1_i32_43 : i32
    %c-1_i32_44 = arith.constant -1 : i32
    %53 = arith.addi %52, %c-1_i32_44 : i32
    %c0_45 = arith.constant 0 : index
    %54 = arith.index_cast %53 : i32 to index
    %c1_46 = arith.constant 1 : index
    %c0_47 = arith.constant 0 : index
    %55 = vector.load %arg2[%c0_45, %54, %c1_46, %c0_47] : memref<1x18x18x4xf32, #tpu.memory_space<vmem>>, vector<1x8x16x4xf32>
    %56 = vector.shape_cast %55 : vector<1x8x16x4xf32> to vector<8x16x4xf32>
    %57 = vector.shape_cast %56 : vector<8x16x4xf32> to vector<128x4xf32>
    %c0_48 = arith.constant 0 : index
    %c8_49 = arith.constant 8 : index
    %58 = vector.load %arg5[%c0_48, %c8_49] : memref<128x16xf32, #tpu.memory_space<vmem>>, vector<128x4xf32>
    tpu.vector_store %arg5[%c0_48, %c8_49], %57 {strides = array<i32>} : memref<128x16xf32, #tpu.memory_space<vmem>>, vector<128x4xf32>,
    %c1_i32_50 = arith.constant 1 : i32
    %59 = arith.addi %1, %c1_i32_50 : i32
    %c-1_i32_51 = arith.constant -1 : i32
    %60 = arith.addi %59, %c-1_i32_51 : i32
    %c0_52 = arith.constant 0 : index
    %61 = arith.index_cast %60 : i32 to index
    %c2_53 = arith.constant 2 : index
    %c0_54 = arith.constant 0 : index
    %62 = vector.load %arg2[%c0_52, %61, %c2_53, %c0_54] : memref<1x18x18x4xf32, #tpu.memory_space<vmem>>, vector<1x8x16x4xf32>
    %63 = vector.shape_cast %62 : vector<1x8x16x4xf32> to vector<8x16x4xf32>
    %64 = vector.shape_cast %63 : vector<8x16x4xf32> to vector<128x4xf32>
    %c0_55 = arith.constant 0 : index
    %c12_56 = arith.constant 12 : index
    %65 = vector.load %arg5[%c0_55, %c12_56] : memref<128x16xf32, #tpu.memory_space<vmem>>, vector<128x4xf32>
    tpu.vector_store %arg5[%c0_55, %c12_56], %64 {strides = array<i32>} : memref<128x16xf32, #tpu.memory_space<vmem>>, vector<128x4xf32>,
    %c0_57 = arith.constant 0 : index
    %c0_58 = arith.constant 0 : index
    %66 = vector.load %arg5[%c0_57, %c0_58] : memref<128x16xf32, #tpu.memory_space<vmem>>, vector<128x16xf32>
    %c1_59 = arith.constant 1 : index
    %c0_60 = arith.constant 0 : index
    %c0_61 = arith.constant 0 : index
    %67 = vector.load %arg3[%c1_59, %c0_60, %c0_61] : memref<4x16x8xf32, #tpu.memory_space<vmem>>, vector<1x16x8xf32>
    %68 = vector.shape_cast %67 : vector<1x16x8xf32> to vector<16x8xf32>
    %cst_62 = arith.constant dense<0.000000e+00> : vector<128x8xf32>
    %69 = tpu.matmul %66, %68, %cst_62 {dimension_numbers = #tpu.dot_dimension_numbers<[1], [0], [0], [1], [0, 0, 1, 1], [], []>} : vector<128x16xf32>, vector<16x8xf32>, vector<128x8xf32> -> vector<128x8xf32>
    %70 = vector.shape_cast %69 : vector<128x8xf32> to vector<8x16x8xf32>
    %c0_63 = arith.constant 0 : index
    %c0_64 = arith.constant 0 : index
    %c0_65 = arith.constant 0 : index
    %c0_66 = arith.constant 0 : index
    %c8_67 = arith.constant 8 : index
    %71 = vector.load %arg4[%c0_63, %c0_64, %c0_65, %c0_66, %c8_67] : memref<1x8x2x16x16xf32, #tpu.memory_space<vmem>>, vector<1x8x1x16x8xf32>
    %72 = vector.shape_cast %71 : vector<1x8x1x16x8xf32> to vector<8x16x8xf32>
    %73 = vector.shape_cast %70 : vector<8x16x8xf32> to vector<1x8x1x16x8xf32>
    tpu.vector_store %arg4[%c0_63, %c0_64, %c0_65, %c0_66, %c8_67], %73 {strides = array<i32>} : memref<1x8x2x16x16xf32, #tpu.memory_space<vmem>>, vector<1x8x1x16x8xf32>,
    %c1_i32_68 = arith.constant 1 : i32
    %74 = arith.addi %1, %c1_i32_68 : i32
    %c0_i32_69 = arith.constant 0 : i32
    %75 = arith.addi %74, %c0_i32_69 : i32
    %c0_70 = arith.constant 0 : index
    %76 = arith.index_cast %75 : i32 to index
    %c1_71 = arith.constant 1 : index
    %c0_72 = arith.constant 0 : index
    %77 = vector.load %arg2[%c0_70, %76, %c1_71, %c0_72] : memref<1x18x18x4xf32, #tpu.memory_space<vmem>>, vector<1x8x16x4xf32>
    %78 = vector.shape_cast %77 : vector<1x8x16x4xf32> to vector<8x16x4xf32>
    %79 = vector.shape_cast %78 : vector<8x16x4xf32> to vector<128x4xf32>
    %c0_73 = arith.constant 0 : index
    %c0_74 = arith.constant 0 : index
    %80 = vector.load %arg5[%c0_73, %c0_74] : memref<128x16xf32, #tpu.memory_space<vmem>>, vector<128x4xf32>
    tpu.vector_store %arg5[%c0_73, %c0_74], %79 {strides = array<i32>} : memref<128x16xf32, #tpu.memory_space<vmem>>, vector<128x4xf32>,
    %c1_i32_75 = arith.constant 1 : i32
    %81 = arith.addi %1, %c1_i32_75 : i32
    %c0_i32_76 = arith.constant 0 : i32
    %82 = arith.addi %81, %c0_i32_76 : i32
    %c0_77 = arith.constant 0 : index
    %83 = arith.index_cast %82 : i32 to index
    %c0_78 = arith.constant 0 : index
    %c0_79 = arith.constant 0 : index
    %84 = vector.load %arg2[%c0_77, %83, %c0_78, %c0_79] : memref<1x18x18x4xf32, #tpu.memory_space<vmem>>, vector<1x8x16x4xf32>
    %85 = vector.shape_cast %84 : vector<1x8x16x4xf32> to vector<8x16x4xf32>
    %86 = vector.shape_cast %85 : vector<8x16x4xf32> to vector<128x4xf32>
    %c0_80 = arith.constant 0 : index
    %c4_81 = arith.constant 4 : index
    %87 = vector.load %arg5[%c0_80, %c4_81] : memref<128x16xf32, #tpu.memory_space<vmem>>, vector<128x4xf32>
    tpu.vector_store %arg5[%c0_80, %c4_81], %86 {strides = array<i32>} : memref<128x16xf32, #tpu.memory_space<vmem>>, vector<128x4xf32>,
    %c1_i32_82 = arith.constant 1 : i32
    %88 = arith.addi %1, %c1_i32_82 : i32
    %c1_i32_83 = arith.constant 1 : i32
    %89 = arith.addi %88, %c1_i32_83 : i32
    %c0_84 = arith.constant 0 : index
    %90 = arith.index_cast %89 : i32 to index
    %c1_85 = arith.constant 1 : index
    %c0_86 = arith.constant 0 : index
    %91 = vector.load %arg2[%c0_84, %90, %c1_85, %c0_86] : memref<1x18x18x4xf32, #tpu.memory_space<vmem>>, vector<1x8x16x4xf32>
    %92 = vector.shape_cast %91 : vector<1x8x16x4xf32> to vector<8x16x4xf32>
    %93 = vector.shape_cast %92 : vector<8x16x4xf32> to vector<128x4xf32>
    %c0_87 = arith.constant 0 : index
    %c8_88 = arith.constant 8 : index
    %94 = vector.load %arg5[%c0_87, %c8_88] : memref<128x16xf32, #tpu.memory_space<vmem>>, vector<128x4xf32>
    tpu.vector_store %arg5[%c0_87, %c8_88], %93 {strides = array<i32>} : memref<128x16xf32, #tpu.memory_space<vmem>>, vector<128x4xf32>,
    %c1_i32_89 = arith.constant 1 : i32
    %95 = arith.addi %1, %c1_i32_89 : i32
    %c1_i32_90 = arith.constant 1 : i32
    %96 = arith.addi %95, %c1_i32_90 : i32
    %c0_91 = arith.constant 0 : index
    %97 = arith.index_cast %96 : i32 to index
    %c0_92 = arith.constant 0 : index
    %c0_93 = arith.constant 0 : index
    %98 = vector.load %arg2[%c0_91, %97, %c0_92, %c0_93] : memref<1x18x18x4xf32, #tpu.memory_space<vmem>>, vector<1x8x16x4xf32>
    %99 = vector.shape_cast %98 : vector<1x8x16x4xf32> to vector<8x16x4xf32>
    %100 = vector.shape_cast %99 : vector<8x16x4xf32> to vector<128x4xf32>
    %c0_94 = arith.constant 0 : index
    %c12_95 = arith.constant 12 : index
    %101 = vector.load %arg5[%c0_94, %c12_95] : memref<128x16xf32, #tpu.memory_space<vmem>>, vector<128x4xf32>
    tpu.vector_store %arg5[%c0_94, %c12_95], %100 {strides = array<i32>} : memref<128x16xf32, #tpu.memory_space<vmem>>, vector<128x4xf32>,
    %c0_96 = arith.constant 0 : index
    %c0_97 = arith.constant 0 : index
    %102 = vector.load %arg5[%c0_96, %c0_97] : memref<128x16xf32, #tpu.memory_space<vmem>>, vector<128x16xf32>
    %c2_98 = arith.constant 2 : index
    %c0_99 = arith.constant 0 : index
    %c0_100 = arith.constant 0 : index
    %103 = vector.load %arg3[%c2_98, %c0_99, %c0_100] : memref<4x16x8xf32, #tpu.memory_space<vmem>>, vector<1x16x8xf32>
    %104 = vector.shape_cast %103 : vector<1x16x8xf32> to vector<16x8xf32>
    %cst_101 = arith.constant dense<0.000000e+00> : vector<128x8xf32>
    %105 = tpu.matmul %102, %104, %cst_101 {dimension_numbers = #tpu.dot_dimension_numbers<[1], [0], [0], [1], [0, 0, 1, 1], [], []>} : vector<128x16xf32>, vector<16x8xf32>, vector<128x8xf32> -> vector<128x8xf32>
    %106 = vector.shape_cast %105 : vector<128x8xf32> to vector<8x16x8xf32>
    %c0_102 = arith.constant 0 : index
    %c0_103 = arith.constant 0 : index
    %c1_104 = arith.constant 1 : index
    %c0_105 = arith.constant 0 : index
    %c0_106 = arith.constant 0 : index
    %107 = vector.load %arg4[%c0_102, %c0_103, %c1_104, %c0_105, %c0_106] : memref<1x8x2x16x16xf32, #tpu.memory_space<vmem>>, vector<1x8x1x16x8xf32>
    %108 = vector.shape_cast %107 : vector<1x8x1x16x8xf32> to vector<8x16x8xf32>
    %109 = vector.shape_cast %106 : vector<8x16x8xf32> to vector<1x8x1x16x8xf32>
    tpu.vector_store %arg4[%c0_102, %c0_103, %c1_104, %c0_105, %c0_106], %109 {strides = array<i32>} : memref<1x8x2x16x16xf32, #tpu.memory_space<vmem>>, vector<1x8x1x16x8xf32>,
    %c1_i32_107 = arith.constant 1 : i32
    %110 = arith.addi %1, %c1_i32_107 : i32
    %c0_i32_108 = arith.constant 0 : i32
    %111 = arith.addi %110, %c0_i32_108 : i32
    %c0_109 = arith.constant 0 : index
    %112 = arith.index_cast %111 : i32 to index
    %c1_110 = arith.constant 1 : index
    %c0_111 = arith.constant 0 : index
    %113 = vector.load %arg2[%c0_109, %112, %c1_110, %c0_111] : memref<1x18x18x4xf32, #tpu.memory_space<vmem>>, vector<1x8x16x4xf32>
    %114 = vector.shape_cast %113 : vector<1x8x16x4xf32> to vector<8x16x4xf32>
    %115 = vector.shape_cast %114 : vector<8x16x4xf32> to vector<128x4xf32>
    %c0_112 = arith.constant 0 : index
    %c0_113 = arith.constant 0 : index
    %116 = vector.load %arg5[%c0_112, %c0_113] : memref<128x16xf32, #tpu.memory_space<vmem>>, vector<128x4xf32>
    tpu.vector_store %arg5[%c0_112, %c0_113], %115 {strides = array<i32>} : memref<128x16xf32, #tpu.memory_space<vmem>>, vector<128x4xf32>,
    %c1_i32_114 = arith.constant 1 : i32
    %117 = arith.addi %1, %c1_i32_114 : i32
    %c0_i32_115 = arith.constant 0 : i32
    %118 = arith.addi %117, %c0_i32_115 : i32
    %c0_116 = arith.constant 0 : index
    %119 = arith.index_cast %118 : i32 to index
    %c2_117 = arith.constant 2 : index
    %c0_118 = arith.constant 0 : index
    %120 = vector.load %arg2[%c0_116, %119, %c2_117, %c0_118] : memref<1x18x18x4xf32, #tpu.memory_space<vmem>>, vector<1x8x16x4xf32>
    %121 = vector.shape_cast %120 : vector<1x8x16x4xf32> to vector<8x16x4xf32>
    %122 = vector.shape_cast %121 : vector<8x16x4xf32> to vector<128x4xf32>
    %c0_119 = arith.constant 0 : index
    %c4_120 = arith.constant 4 : index
    %123 = vector.load %arg5[%c0_119, %c4_120] : memref<128x16xf32, #tpu.memory_space<vmem>>, vector<128x4xf32>
    tpu.vector_store %arg5[%c0_119, %c4_120], %122 {strides = array<i32>} : memref<128x16xf32, #tpu.memory_space<vmem>>, vector<128x4xf32>,
    %c1_i32_121 = arith.constant 1 : i32
    %124 = arith.addi %1, %c1_i32_121 : i32
    %c1_i32_122 = arith.constant 1 : i32
    %125 = arith.addi %124, %c1_i32_122 : i32
    %c0_123 = arith.constant 0 : index
    %126 = arith.index_cast %125 : i32 to index
    %c1_124 = arith.constant 1 : index
    %c0_125 = arith.constant 0 : index
    %127 = vector.load %arg2[%c0_123, %126, %c1_124, %c0_125] : memref<1x18x18x4xf32, #tpu.memory_space<vmem>>, vector<1x8x16x4xf32>
    %128 = vector.shape_cast %127 : vector<1x8x16x4xf32> to vector<8x16x4xf32>
    %129 = vector.shape_cast %128 : vector<8x16x4xf32> to vector<128x4xf32>
    %c0_126 = arith.constant 0 : index
    %c8_127 = arith.constant 8 : index
    %130 = vector.load %arg5[%c0_126, %c8_127] : memref<128x16xf32, #tpu.memory_space<vmem>>, vector<128x4xf32>
    tpu.vector_store %arg5[%c0_126, %c8_127], %129 {strides = array<i32>} : memref<128x16xf32, #tpu.memory_space<vmem>>, vector<128x4xf32>,
    %c1_i32_128 = arith.constant 1 : i32
    %131 = arith.addi %1, %c1_i32_128 : i32
    %c1_i32_129 = arith.constant 1 : i32
    %132 = arith.addi %131, %c1_i32_129 : i32
    %c0_130 = arith.constant 0 : index
    %133 = arith.index_cast %132 : i32 to index
    %c2_131 = arith.constant 2 : index
    %c0_132 = arith.constant 0 : index
    %134 = vector.load %arg2[%c0_130, %133, %c2_131, %c0_132] : memref<1x18x18x4xf32, #tpu.memory_space<vmem>>, vector<1x8x16x4xf32>
    %135 = vector.shape_cast %134 : vector<1x8x16x4xf32> to vector<8x16x4xf32>
    %136 = vector.shape_cast %135 : vector<8x16x4xf32> to vector<128x4xf32>
    %c0_133 = arith.constant 0 : index
    %c12_134 = arith.constant 12 : index
    %137 = vector.load %arg5[%c0_133, %c12_134] : memref<128x16xf32, #tpu.memory_space<vmem>>, vector<128x4xf32>
    tpu.vector_store %arg5[%c0_133, %c12_134], %136 {strides = array<i32>} : memref<128x16xf32, #tpu.memory_space<vmem>>, vector<128x4xf32>,
    %c0_135 = arith.constant 0 : index
    %c0_136 = arith.constant 0 : index
    %138 = vector.load %arg5[%c0_135, %c0_136] : memref<128x16xf32, #tpu.memory_space<vmem>>, vector<128x16xf32>
    %c3 = arith.constant 3 : index
    %c0_137 = arith.constant 0 : index
    %c0_138 = arith.constant 0 : index
    %139 = vector.load %arg3[%c3, %c0_137, %c0_138] : memref<4x16x8xf32, #tpu.memory_space<vmem>>, vector<1x16x8xf32>
    %140 = vector.shape_cast %139 : vector<1x16x8xf32> to vector<16x8xf32>
    %cst_139 = arith.constant dense<0.000000e+00> : vector<128x8xf32>
    %141 = tpu.matmul %138, %140, %cst_139 {dimension_numbers = #tpu.dot_dimension_numbers<[1], [0], [0], [1], [0, 0, 1, 1], [], []>} : vector<128x16xf32>, vector<16x8xf32>, vector<128x8xf32> -> vector<128x8xf32>
    %142 = vector.shape_cast %141 : vector<128x8xf32> to vector<8x16x8xf32>
    %c0_140 = arith.constant 0 : index
    %c0_141 = arith.constant 0 : index
    %c1_142 = arith.constant 1 : index
    %c0_143 = arith.constant 0 : index
    %c8_144 = arith.constant 8 : index
    %143 = vector.load %arg4[%c0_140, %c0_141, %c1_142, %c0_143, %c8_144] : memref<1x8x2x16x16xf32, #tpu.memory_space<vmem>>, vector<1x8x1x16x8xf32>
    %144 = vector.shape_cast %143 : vector<1x8x1x16x8xf32> to vector<8x16x8xf32>
    %145 = vector.shape_cast %142 : vector<8x16x8xf32> to vector<1x8x1x16x8xf32>
    tpu.vector_store %arg4[%c0_140, %c0_141, %c1_142, %c0_143, %c8_144], %145 {strides = array<i32>} : memref<1x8x2x16x16xf32, #tpu.memory_space<vmem>>, vector<1x8x1x16x8xf32>,
    return
  }
  func.func @transform_0(%arg0: i32, %arg1: i32) -> (i32, i32, i32, i32) {
    %c0_i32 = arith.constant 0 : i32
    %c0_i32_0 = arith.constant 0 : i32
    %c0_i32_1 = arith.constant 0 : i32
    %c0_i32_2 = arith.constant 0 : i32
    return %arg0, %c0_i32, %c0_i32_0, %c0_i32_1 : i32, i32, i32, i32
  }
  func.func @transform_1(%arg0: i32, %arg1: i32) -> (i32, i32, i32) {
    %c0_i32 = arith.constant 0 : i32
    %c0_i32_0 = arith.constant 0 : i32
    %c0_i32_1 = arith.constant 0 : i32
    %c0_i32_2 = arith.constant 0 : i32
    return %c0_i32, %c0_i32_0, %c0_i32_1 : i32, i32, i32
  }
  func.func @transform_2(%arg0: i32, %arg1: i32) -> (i32, i32, i32, i32, i32) {
    %c0_i32 = arith.constant 0 : i32
    %c0_i32_0 = arith.constant 0 : i32
    %c0_i32_1 = arith.constant 0 : i32
    %c0_i32_2 = arith.constant 0 : i32
    return %arg0, %arg1, %c0_i32, %c0_i32_0, %c0_i32_1 : i32, i32, i32, i32, i32
  }
}

</mosaic_0001>

<bundles_post_ra>
// kernel: _upsample_forward.2
= control target key start
LH: loop header
LB: loop body
LE: loop exit
PB: predicated region body
PF: predicated region fallthrough
CT: control target
= control target key end

     0   :  { %s543_s6 = smov 0   ;;  %s545_s7 = smov 0   ;;  %s728_s0 = inlined_call_operand.vmem [shape: f32[2,4,256], index: 0, kind: input, shape index: {}]   ;;  %s729_s1 = inlined_call_operand.vmem [shape: f32[2,18,18,4], index: 1, kind: output, shape index: {}]  }
   0x1   :  { %s547_s8 = smov 0  }
   0x2 LB: > { %s23_s9 = sadd.s32 1, %s525_s7  ;;  %p435_p0 = scmp.ge.s32.totalorder %s529_s8, 1  ;;  %s529_s8 = sphi %s547_s8, %s11_s8   ;;  %s525_s7 = sphi %s545_s7, %s731_s7   ;;  %s521_s6 = sphi %s543_s6, %s730_s6  }
   0x3   : > { %p25_p1 = scmp.ge.s32.totalorder %s23_s9, 2  ;;  %p107_p2 = scmp.lt.s32.totalorder %s529_s8, 3 }
   0x5   : > { %s733_s9 = smov (%p25_p1, %s23_s9), 0  ;;  %p108_p3 = pnand %p435_p0, %p107_p2 }
   0x6   : > { %p134_p4 = scmp.lt.s32.totalorder (!%p108_p3), %s521_s6, 1 }
   0x7   : > { %111 = sbr.rel (%p108_p3) target bundleno = 440 (0x1b8), region = 24 }
   0xc   : > { %s735_s6 = smov (!%p134_p4, %s521_s6), 1  ;;  %vm155_vm0 = vcmask 1043456   ;;  %v531_v16 = vmov 839922192   ;;  %v178_v18 = vlaneseq  ;;  %vm266_vm2 = vcmask 31744  }
   0xd   : > { %s476_s10 = sshll.u32 %s735_s6, 3  ;;  %v176_v17 = vunpack.c.l.s4 %v531_v16  ;;  %s477_s14 = smul.u32 432, %s735_s6  ;;  %vm269_vm3 = vcmask 25600   ;;  %v532_v31 = vmov 0.0   ;;  %vm275_vm4 = vcmask 24576  }
   0xe   : > { %s142_s13 = scalar_lea.vmem %s728_s0, %s476_s10  ;;  %v179_v21 = vshrl.u32 %v178_v18, 7 }
   0xf   : > { %v151_v0 = vld [vmem:[%s142_s13] sm:$0xff]  ;;  %v177_v20 = vunpack.c.0.s8 %v176_v17  ;;  %s571_s17 = scalar_lea.vmem %s729_s1, %s477_s14 }
  0x10   : > { %v153_v1 = vcombine.high %v151_v0, %v151_v0  ;;  %v156_v2 = vsel %vm155_vm0, %v151_v0, 0.0  ;;  %v162_v3 = vmul.f32 %v151_v0, %v151_v0  ;;  %267 = vst.msk [vmem:[%s571_s17] sm:$0xff] %vm266_vm2, %v532_v31  ;;  %268 = vst.msk [vmem:[%s571_s17 + $0x8] sm:$0xff] %vm266_vm2, %v532_v31 }
  0x11   : > { %v180_v22 = vsub.s32 %v177_v20, %v179_v21  ;;  %270 = vst.msk [vmem:[%s571_s17 + $0x10] sm:$0x3] %vm269_vm3, %v532_v31  ;;  %441 = vst.msk [vmem:[%s571_s17 + $0x1a8] sm:$0x3] %vm269_vm3, %v532_v31 }
  0x12   : > { %v157_v4 = vsel %vm155_vm0, %v153_v1, 0.0  ;;  %v164_v5 = vcombine.high %v162_v3, %v162_v3  ;;  %v166_v6 = vsel %vm155_vm0, %v162_v3, 0.0  ;;  %439 = vst.msk [vmem:[%s571_s17 + $0x198] sm:$0xff] %vm266_vm2, %v532_v31  ;;  %440 = vst.msk [vmem:[%s571_s17 + $0x1a0] sm:$0xff] %vm266_vm2, %v532_v31 }
  0x13   : > { %v158_v7 = vadd.f32 %v157_v4, %v156_v2  ;;  %276 = vst.msk [vmem:[%s571_s17] sm:$0x1] %vm275_vm4, %v532_v31  ;;  %277 = vst.msk [vmem:[%s571_s17 + $0x18] sm:$0x1] %vm275_vm4, %v532_v31 }
  0x14   : > { %v167_v8 = vsel %vm155_vm0, %v164_v5, 0.0  ;;  %278 = vst.msk [vmem:[%s571_s17 + $0x30] sm:$0x1] %vm275_vm4, %v532_v31  ;;  %279 = vst.msk [vmem:[%s571_s17 + $0x48] sm:$0x1] %vm275_vm4, %v532_v31 }
  0x15   : > { %159 = vadd.xlane.f32.xlu0 %v158_v7  ;;  %v168_v9 = vadd.f32 %v167_v8, %v166_v6  ;;  %280 = vst.msk [vmem:[%s571_s17 + $0x60] sm:$0x1] %vm275_vm4, %v532_v31  ;;  %281 = vst.msk [vmem:[%s571_s17 + $0x78] sm:$0x1] %vm275_vm4, %v532_v31 }
  0x16   : > { %282 = vst.msk [vmem:[%s571_s17 + $0x90] sm:$0x1] %vm275_vm4, %v532_v31  ;;  %283 = vst.msk [vmem:[%s571_s17 + $0xa8] sm:$0x1] %vm275_vm4, %v532_v31 }
  0x17   : > { %284 = vst.msk [vmem:[%s571_s17 + $0xc0] sm:$0x1] %vm275_vm4, %v532_v31  ;;  %285 = vst.msk [vmem:[%s571_s17 + $0xd8] sm:$0x1] %vm275_vm4, %v532_v31 }
  0x18   : > { %286 = vst.msk [vmem:[%s571_s17 + $0xf0] sm:$0x1] %vm275_vm4, %v532_v31  ;;  %287 = vst.msk [vmem:[%s571_s17 + $0x108] sm:$0x1] %vm275_vm4, %v532_v31 }
  0x19   : > { %169 = vadd.xlane.f32.xlu0 %v168_v9  ;;  %288 = vst.msk [vmem:[%s571_s17 + $0x120] sm:$0x1] %vm275_vm4, %v532_v31  ;;  %289 = vst.msk [vmem:[%s571_s17 + $0x138] sm:$0x1] %vm275_vm4, %v532_v31 }
  0x1a   : > { %290 = vst.msk [vmem:[%s571_s17 + $0x150] sm:$0x1] %vm275_vm4, %v532_v31  ;;  %291 = vst.msk [vmem:[%s571_s17 + $0x168] sm:$0x1] %vm275_vm4, %v532_v31 }
  0x1b   : > { %292 = vst.msk [vmem:[%s571_s17 + $0x180] sm:$0x1] %vm275_vm4, %v532_v31  ;;  %293 = vst.msk [vmem:[%s571_s17 + $0x198] sm:$0x1] %vm275_vm4, %v532_v31 }
  0x1c   : > { %294 = vst.msk [vmem:[%s571_s17 + $0x11] sm:$0x1] %vm275_vm4, %v532_v31  ;;  %295 = vst.msk [vmem:[%s571_s17 + $0x29] sm:$0x1] %vm275_vm4, %v532_v31 }
  0x1d   : > { %296 = vst.msk [vmem:[%s571_s17 + $0x41] sm:$0x1] %vm275_vm4, %v532_v31  ;;  %297 = vst.msk [vmem:[%s571_s17 + $0x59] sm:$0x1] %vm275_vm4, %v532_v31 }
  0x1e   : > { %298 = vst.msk [vmem:[%s571_s17 + $0x71] sm:$0x1] %vm275_vm4, %v532_v31  ;;  %299 = vst.msk [vmem:[%s571_s17 + $0x89] sm:$0x1] %vm275_vm4, %v532_v31 }
  0x1f   : > { %300 = vst.msk [vmem:[%s571_s17 + $0xa1] sm:$0x1] %vm275_vm4, %v532_v31  ;;  %301 = vst.msk [vmem:[%s571_s17 + $0xb9] sm:$0x1] %vm275_vm4, %v532_v31 }
  0x20   : > { %302 = vst.msk [vmem:[%s571_s17 + $0xd1] sm:$0x1] %vm275_vm4, %v532_v31  ;;  %303 = vst.msk [vmem:[%s571_s17 + $0xe9] sm:$0x1] %vm275_vm4, %v532_v31 }
  0x21   : > { %304 = vst.msk [vmem:[%s571_s17 + $0x101] sm:$0x1] %vm275_vm4, %v532_v31  ;;  %305 = vst.msk [vmem:[%s571_s17 + $0x119] sm:$0x1] %vm275_vm4, %v532_v31 }
  0x22   : > { %306 = vst.msk [vmem:[%s571_s17 + $0x131] sm:$0x1] %vm275_vm4, %v532_v31  ;;  %307 = vst.msk [vmem:[%s571_s17 + $0x149] sm:$0x1] %vm275_vm4, %v532_v31 }
  0x23   : > { %308 = vst.msk [vmem:[%s571_s17 + $0x161] sm:$0x1] %vm275_vm4, %v532_v31  ;;  %309 = vst.msk [vmem:[%s571_s17 + $0x179] sm:$0x1] %vm275_vm4, %v532_v31 }
  0x24   : > { %310 = vst.msk [vmem:[%s571_s17 + $0x191] sm:$0x1] %vm275_vm4, %v532_v31  ;;  %311 = vst.msk [vmem:[%s571_s17 + $0x1a9] sm:$0x1] %vm275_vm4, %v532_v31 }
  0x9e   : > { %v160_v10 = vpop.xlane.xlu0 %159 }
  0x9f   : > { %v161_v11 = vmul.f32 0.00390625, %v160_v10 }
  0xa1   : > { %v172_v13 = vmul.f32 %v161_v11, %v161_v11  ;;  %v181_v23 = vrot.slane %v161_v11, %v180_v22 }
  0xa2   : > { %v170_v12 = vpop.xlane.xlu0 %169 }
  0xa3   : > { %v171_v14 = vmul.f32 0.00390625, %v170_v12  ;;  %v183_v25 = vsub.f32 %v151_v0, %v181_v23 }
  0xa5   : > { %v173_v15 = vsub.f32 %v171_v14, %v172_v13 }
  0xa7   : > { %v184_v19 = vadd.f32 1e-05, %v173_v15 }
  0xa9   : > { %505 = vrsqrt.f32 %v184_v19 }
  0xb6   : > { %v506_v24 = vpop.eup %505 }
  0xb7   : > { %v193_v26 = vrot.slane %v506_v24, %v180_v22 }
  0xb9   : > { %v195_v27 = vmul.f32 %v193_v26, %v183_v25 }
  0xbb   : > { %vm196_vm1 = vcmp.ge.f32.partialorder %v195_v27, 0.0  ;;  %v197_v28 = vmul.f32 0.2, %v195_v27 }
  0xbd   : > { %v198_v29 = vsel %vm196_vm1, %v195_v27, %v197_v28 }
  0xbe   : > { %202 = vxpose.xlu1.b32.start.end [1/1] (short) %v198_v29, 128  ;;  %v200_v30 = vcombine.high %v198_v29, %v198_v29 }
  0xfb   : > { %234 = vxpose.xlu1.b32.start.end [1/1] (short) %v200_v30, 128 }
 0x13a   : > { %v218_v32 = vpop.trf.xlu1 }
 0x13b   : > { %442 = vst.msk [vmem:[%s571_s17 + $0x19] sm:$0xff] %vm266_vm2, %v218_v32 }
 0x13e   : > { %v219_v33 = vpop.trf.xlu1 }
 0x13f   : > { %443 = vst.msk [vmem:[%s571_s17 + $0x21] sm:$0xff] %vm266_vm2, %v219_v33 }
 0x142   : > { %v220_v34 = vpop.trf.xlu1 }
 0x143   : > { %444 = vst.msk [vmem:[%s571_s17 + $0x31] sm:$0xff] %vm266_vm2, %v220_v34 }
 0x146   : > { %v221_v35 = vpop.trf.xlu1 }
 0x147   : > { %445 = vst.msk [vmem:[%s571_s17 + $0x39] sm:$0xff] %vm266_vm2, %v221_v35 }
 0x14a   : > { %v222_v36 = vpop.trf.xlu1 }
 0x14b   : > { %446 = vst.msk [vmem:[%s571_s17 + $0x49] sm:$0xff] %vm266_vm2, %v222_v36 }
 0x14e   : > { %v223_v37 = vpop.trf.xlu1 }
 0x14f   : > { %447 = vst.msk [vmem:[%s571_s17 + $0x51] sm:$0xff] %vm266_vm2, %v223_v37 }
 0x152   : > { %v224_v38 = vpop.trf.xlu1 }
 0x153   : > { %448 = vst.msk [vmem:[%s571_s17 + $0x61] sm:$0xff] %vm266_vm2, %v224_v38 }
 0x156   : > { %v225_v39 = vpop.trf.xlu1 }
 0x157   : > { %449 = vst.msk [vmem:[%s571_s17 + $0x69] sm:$0xff] %vm266_vm2, %v225_v39 }
 0x15a   : > { %v226_v40 = vpop.trf.xlu1 }
 0x15b   : > { %450 = vst.msk [vmem:[%s571_s17 + $0x79] sm:$0xff] %vm266_vm2, %v226_v40 }
 0x15e   : > { %v227_v41 = vpop.trf.xlu1 }
 0x15f   : > { %451 = vst.msk [vmem:[%s571_s17 + $0x81] sm:$0xff] %vm266_vm2, %v227_v41 }
 0x162   : > { %v228_v42 = vpop.trf.xlu1 }
 0x163   : > { %452 = vst.msk [vmem:[%s571_s17 + $0x91] sm:$0xff] %vm266_vm2, %v228_v42 }
 0x166   : > { %v229_v43 = vpop.trf.xlu1 }
 0x167   : > { %453 = vst.msk [vmem:[%s571_s17 + $0x99] sm:$0xff] %vm266_vm2, %v229_v43 }
 0x16a   : > { %v230_v44 = vpop.trf.xlu1 }
 0x16b   : > { %454 = vst.msk [vmem:[%s571_s17 + $0xa9] sm:$0xff] %vm266_vm2, %v230_v44 }
 0x16e   : > { %v231_v45 = vpop.trf.xlu1 }
 0x16f   : > { %455 = vst.msk [vmem:[%s571_s17 + $0xb1] sm:$0xff] %vm266_vm2, %v231_v45 }
 0x172   : > { %v232_v46 = vpop.trf.xlu1 }
 0x173   : > { %456 = vst.msk [vmem:[%s571_s17 + $0xc1] sm:$0xff] %vm266_vm2, %v232_v46 }
 0x176   : > { %v233_v47 = vpop.trf.xlu1 }
 0x177   : > { %457 = vst.msk [vmem:[%s571_s17 + $0xc9] sm:$0xff] %vm266_vm2, %v233_v47 }
 0x17a   : > { %v250_v48 = vpop.trf.xlu1 }
 0x17b   : > { %458 = vst.msk [vmem:[%s571_s17 + $0xd9] sm:$0xff] %vm266_vm2, %v250_v48 }
 0x17e   : > { %v251_v49 = vpop.trf.xlu1 }
 0x17f   : > { %459 = vst.msk [vmem:[%s571_s17 + $0xe1] sm:$0xff] %vm266_vm2, %v251_v49 }
 0x182   : > { %v252_v50 = vpop.trf.xlu1 }
 0x183   : > { %460 = vst.msk [vmem:[%s571_s17 + $0xf1] sm:$0xff] %vm266_vm2, %v252_v50 }
 0x186   : > { %v253_v51 = vpop.trf.xlu1 }
 0x187   : > { %461 = vst.msk [vmem:[%s571_s17 + $0xf9] sm:$0xff] %vm266_vm2, %v253_v51 }
 0x18a   : > { %v254_v52 = vpop.trf.xlu1 }
 0x18b   : > { %462 = vst.msk [vmem:[%s571_s17 + $0x109] sm:$0xff] %vm266_vm2, %v254_v52 }
 0x18e   : > { %v255_v53 = vpop.trf.xlu1 }
 0x18f   : > { %463 = vst.msk [vmem:[%s571_s17 + $0x111] sm:$0xff] %vm266_vm2, %v255_v53 }
 0x192   : > { %v256_v54 = vpop.trf.xlu1 }
 0x193   : > { %464 = vst.msk [vmem:[%s571_s17 + $0x121] sm:$0xff] %vm266_vm2, %v256_v54 }
 0x196   : > { %v257_v55 = vpop.trf.xlu1 }
 0x197   : > { %465 = vst.msk [vmem:[%s571_s17 + $0x129] sm:$0xff] %vm266_vm2, %v257_v55 }
 0x19a   : > { %v258_v56 = vpop.trf.xlu1 }
 0x19b   : > { %466 = vst.msk [vmem:[%s571_s17 + $0x139] sm:$0xff] %vm266_vm2, %v258_v56 }
 0x19e   : > { %v259_v57 = vpop.trf.xlu1 }
 0x19f   : > { %467 = vst.msk [vmem:[%s571_s17 + $0x141] sm:$0xff] %vm266_vm2, %v259_v57 }
 0x1a2   : > { %v260_v58 = vpop.trf.xlu1 }
 0x1a3   : > { %468 = vst.msk [vmem:[%s571_s17 + $0x151] sm:$0xff] %vm266_vm2, %v260_v58 }
 0x1a6   : > { %v261_v59 = vpop.trf.xlu1 }
 0x1a7   : > { %469 = vst.msk [vmem:[%s571_s17 + $0x159] sm:$0xff] %vm266_vm2, %v261_v59 }
 0x1aa   : > { %v262_v60 = vpop.trf.xlu1 }
 0x1ab   : > { %470 = vst.msk [vmem:[%s571_s17 + $0x169] sm:$0xff] %vm266_vm2, %v262_v60 }
 0x1ae   : > { %v263_v61 = vpop.trf.xlu1 }
 0x1af   : > { %471 = vst.msk [vmem:[%s571_s17 + $0x171] sm:$0xff] %vm266_vm2, %v263_v61 }
 0x1b2   : > { %v264_v62 = vpop.trf.xlu1 }
 0x1b3   : > { %472 = vst.msk [vmem:[%s571_s17 + $0x181] sm:$0xff] %vm266_vm2, %v264_v62 }
 0x1b6   : > { %v265_v63 = vpop.trf.xlu1 }
 0x1b7   : > { %473 = vst.msk [vmem:[%s571_s17 + $0x189] sm:$0xff] %vm266_vm2, %v265_v63 }
 0x1b8 PF: > { %s11_s8 = sadd.s32 1, %s529_s8   ;;  %s730_s6 = smov %s525_s7 }
 0x1b9   : > { %p8_p5 = scmp.ge.s32.totalorder %s11_s8, 4   ;;  %s731_s7 = smov %s733_s9 }
 0x1bb   :  { %10 = sbr.rel (!%p8_p5) target bundleno = 2 (0x2), region = 56 }

// kernel: _upsample_forward.3
= control target key start
LH: loop header
LB: loop body
LE: loop exit
PB: predicated region body
PF: predicated region fallthrough
CT: control target
= control target key end

     0   :  { %s3203_s9 = smov 0   ;;  %s3205_s10 = smov 0   ;;  %s4401_s0 = inlined_call_operand.vmem [shape: f32[2,18,18,4], index: 0, kind: input, shape index: {}]   ;;  %s4402_s1 = inlined_call_operand.vmem [shape: f32[4,16,8], index: 1, kind: input, shape index: {}]   ;;  %s4403_s2 = inlined_call_operand.vmem [shape: f32[2,16,2,16,16], index: 2, kind: output, shape index: {}]  }
   0x1   :  { %s3207_s11 = smov 0   ;;  %s3209_s12 = smov 0  }
   0x2   :  { %s3211_s13 = smov 0  }
   0x3 LB: > { %s21_s14 = sadd.s32 1, %s3175_s11  ;;  %s24_s15 = sadd.s32 1, %s3179_s12  ;;  %s3183_s13 = sphi %s3211_s13, %s12_s13   ;;  %s3179_s12 = sphi %s3209_s12, %s4407_s12   ;;  %s3175_s11 = sphi %s3207_s11, %s4406_s11   ;;  %s3171_s10 = sphi %s3205_s10, %s4405_s10   ;;  %s3167_s9 = sphi %s3203_s9, %s4404_s9  }
   0x4   : > { %p22_p0 = scmp.ge.s32.totalorder %s21_s14, 2  ;;  %p2609_p1 = scmp.ge.s32.totalorder %s3183_s13, 1 }
   0x5   : > { %p126_p2 = scmp.lt.s32.totalorder %s3183_s13, 5 }
   0x6   : > { %s4409_s14 = smov (%p22_p0, %s21_s14), 0  ;;  %s4411_s15 = smov (!%p22_p0, %s24_s15), %s3179_s12 }
   0x7   : > { %p127_p3 = pnand %p2609_p1, %p126_p2  ;;  %p26_p4 = scmp.ge.s32.totalorder %s4411_s15, 2 }
   0x8   : > { %p153_p5 = scmp.lt.s32.totalorder (!%p127_p3), %s3171_s10, 1  ;;  %s2617_s16 = smul.u32 (!%p127_p3), 192, %s3167_s9 }
   0x9   : > { %s4413_s15 = smov (%p26_p4, %s4411_s15), 0  ;;  %130 = sbr.rel (%p127_p3) target bundleno = 836 (0x344), region = 28 }
   0xa   : > { %s3185_s22 = smov (!%p127_p3), 4   ;;  %s3186_s23 = smov (!%p127_p3), 8  }
   0xb   : > { %s3187_s28 = smov (!%p127_p3), 12  }
   0xe   : > { %s4415_s10 = smov (!%p153_p5, %s3171_s10), 1  ;;  %vm189_vm0 = vcmask 31744   ;;  %v516_v34 = vld [vmem:[%s4402_s1 + $0x8] sm:$0xff]  ;;  %v515_v35 = vld [vmem:[%s4402_s1] sm:$0xff]  ;;  %v2700_v40 = vld [vmem:[%s4402_s1 + $0x18] sm:$0xff]  ;;  %vm286_vm1 = vcmask 64544  }
   0xf   : > { %s3101_s17 = smul.u32 432, %s4415_s10  ;;  %2989 = vmatprep.subr.mxu0 %v516_v34  ;;  %v2699_v41 = vld [vmem:[%s4402_s1 + $0x10] sm:$0xff]  ;;  %3017 = vmatprep.subr.mxu1 %v2700_v40  ;;  %vm385_vm2 = vcmask 97344   ;;  %vm482_vm3 = vcmask 130144   ;;  %vm517_vm4 = vcmask 130048   ;;  %s2613_s24 = sshll.u32 %s4415_s10, 6 }
  0x10   : > { %2990 = vmatpush3.msra.mxu0 %v516_v34  ;;  %3018 = vmatpush3.msra.mxu1 %v2700_v40  ;;  %vm711_vm5 = vcmask 64512   ;;  %vm1324_vm6 = vcmask 130112  }
  0x11   : > { %s157_s20 = scalar_lea.vmem %s4401_s0, %s3101_s17  ;;  %2991 = vmatprep.subr.mxu0 %v515_v35  ;;  %3019 = vmatprep.subr.mxu1 %v2699_v41 }
  0x12   : > { %s3242_s21 = scalar_lea.vmem %s157_s20, %s2617_s16  ;;  %2992 = vmatpush3.msra.mxu0 %v515_v35  ;;  %3020 = vmatpush3.msra.mxu1 %v2699_v41  ;;  %s2611_s20 = sshll.u32 %s3167_s9, 3 }
  0x13   : > { %v3245_v0 = vld [vmem:[%s3242_s21 + $0x30] sm:$0xff]  ;;  %v3248_v1 = vld [vmem:[%s3242_s21 + $0x18] sm:$0xff]  ;;  %v3258_v3 = vld [vmem:[%s3242_s21 + $0x20] sm:$0xff]  ;;  %p161_p6 = scmp.lt.s32.totalorder %s2611_s20, 15 }
  0x14   : > { %242 = vrot.lane.b32.xlu1 %v3245_v0, %s3185_s22  ;;  %238 = vrot.lane.b32.xlu0 %v3248_v1, %s3185_s22  ;;  %v3255_v2 = vld [vmem:[%s3242_s21 + $0x38] sm:$0xff]  ;;  %v3265_v4 = vld [vmem:[%s3242_s21 + $0x50] sm:$0xff] }
  0x15   : > { %v3268_v5 = vld [vmem:[%s3242_s21 + $0x48] sm:$0xff]  ;;  %v3274_v7 = vld [vmem:[%s3242_s21 + $0x19] sm:$0xff]  ;;  %v3280_v9 = vld [vmem:[%s3242_s21 + $0x31] sm:$0xff]  ;;  %s4417_s20 = smov (!%p161_p6, %s2611_s20), 15 }
  0x16   : > { %v3271_v6 = vld [vmem:[%s3242_s21 + $0x21] sm:$0xff]  ;;  %v3277_v8 = vld [vmem:[%s3242_s21 + $0x39] sm:$0xff]  ;;  %v3288_v11 = vld [vmem:[%s3242_s21 + $0x51] sm:$0xff]  ;;  %192 = vst.msk [vmem:[#allocation2 + $0x10] sm:$0xff] %vm189_vm0, %v3280_v9  ;;  %s2612_s9 = sshll.u32 %s4417_s20, 2 }
  0x17   : > { %191 = vst.msk [vmem:[#allocation2 + $0x8] sm:$0xff] %vm189_vm0, %v3271_v6  ;;  %v3285_v10 = vld [vmem:[%s3242_s21 + $0x68] sm:$0xff]  ;;  %190 = vst.msk [vmem:[#allocation2] sm:$0xff] %vm189_vm0, %v3274_v7  ;;  %v3319_v16 = vld [vmem:[%s3242_s21 + $0x60] sm:$0xff]  ;;  %s165_s25 = sadd.s32 %s2613_s24, %s2612_s9 }
  0x18   : > { %244 = vrot.lane.b32.xlu1 %v3255_v2, %s3185_s22  ;;  %240 = vrot.lane.b32.xlu0 %v3258_v3, %s3185_s22  ;;  %v3291_v12 = vld [vmem:[%s3242_s21 + $0x49] sm:$0xff]  ;;  %193 = vst.msk [vmem:[#allocation2 + $0x18] sm:$0xff] %vm189_vm0, %v3277_v8  ;;  %v3307_v14 = vld [vmem:[%s3242_s21 + $0x61] sm:$0xff]  ;;  %195 = vst.msk [vmem:[#allocation2 + $0x28] sm:$0xff] %vm189_vm0, %v3288_v11  ;;  %s2614_s10 = sshll.u32 %s165_s25, 3 }
  0x19   : > { %v3294_v13 = vld [vmem:[%s3242_s21 + $0x69] sm:$0xff]  ;;  %v3310_v15 = vld [vmem:[%s3242_s21 + $0x81] sm:$0xff]  ;;  %194 = vst.msk [vmem:[#allocation2 + $0x20] sm:$0xff] %vm189_vm0, %v3291_v12  ;;  %v3322_v17 = vld [vmem:[%s3242_s21 + $0x79] sm:$0xff]  ;;  %s4116_s29 = scalar_lea.vmem %s4403_s2, %s2614_s10 }
  0x1a   : > { %197 = vst.msk [vmem:[#allocation2 + $0x38] sm:$0xff] %vm189_vm0, %v3294_v13  ;;  %v3325_v18 = vld [vmem:[%s3242_s21 + $0x91] sm:$0xff]  ;;  %196 = vst.msk [vmem:[#allocation2 + $0x30] sm:$0xff] %vm189_vm0, %v3307_v14  ;;  %v3340_v19 = vld [vmem:[%s3242_s21 + $0x80] sm:$0xff] }
  0x1b   : > { %199 = vst.msk [vmem:[#allocation2 + $0x48] sm:$0xff] %vm189_vm0, %v3310_v15  ;;  %198 = vst.msk [vmem:[#allocation2 + $0x40] sm:$0xff] %vm189_vm0, %v3322_v17  ;;  %v3343_v20 = vld [vmem:[%s3242_s21 + $0x78] sm:$0xff]  ;;  %v3354_v23 = vld [vmem:[%s3242_s21 + $0xa9] sm:$0xff] }
  0x1c   : > { %248 = vrot.lane.b32.xlu1 %v3265_v4, %s3185_s22  ;;  %246 = vrot.lane.b32.xlu0 %v3268_v5, %s3185_s22  ;;  %200 = vst.msk [vmem:[#allocation2 + $0x50] sm:$0xff] %vm189_vm0, %v3325_v18  ;;  %v3346_v21 = vld [vmem:[%s3242_s21 + $0x99] sm:$0xff]  ;;  %v3351_v22 = vld [vmem:[%s3242_s21 + $0xb1] sm:$0xff]  ;;  %202 = vst.msk [vmem:[#allocation2 + $0x60] sm:$0xff] %vm189_vm0, %v3354_v23 }
  0x1d   : > { %201 = vst.msk [vmem:[#allocation2 + $0x58] sm:$0xff] %vm189_vm0, %v3346_v21  ;;  %v3357_v24 = vld [vmem:[%s3242_s21 + $0xc9] sm:$0xff]  ;;  %203 = vst.msk [vmem:[#allocation2 + $0x68] sm:$0xff] %vm189_vm0, %v3351_v22  ;;  %v3370_v25 = vld [vmem:[%s3242_s21 + $0xc1] sm:$0xff] }
  0x1e   : > { %205 = vst.msk [vmem:[#allocation2 + $0x78] sm:$0xff] %vm189_vm0, %v3357_v24  ;;  %v3373_v26 = vld [vmem:[%s3242_s21 + $0x98] sm:$0xff]  ;;  %v3376_v27 = vld [vmem:[%s3242_s21 + $0x90] sm:$0xff]  ;;  %204 = vst.msk [vmem:[#allocation2 + $0x70] sm:$0xff] %vm189_vm0, %v3370_v25 }
  0x1f   : > { %v3385_v28 = vld [vmem:[%s3242_s21 + $0xb0] sm:$0xff]  ;;  %v3388_v29 = vld [vmem:[%s3242_s21 + $0xa8] sm:$0xff]  ;;  %v2648_v31 = vld [vmem:[%s3242_s21 + $0xc0] sm:$0xff] }
  0x20   : > { %252 = vrot.lane.b32.xlu1 %v3285_v10, %s3185_s22  ;;  %250 = vrot.lane.b32.xlu0 %v3319_v16, %s3185_s22  ;;  %v2649_v30 = vld [vmem:[%s3242_s21 + $0xc8] sm:$0xff]  ;;  %v402_v36 = vld [vmem:[%s3242_s21] sm:$0xff] }
  0x21   : > { %v306_v32 = vld [vmem:[%s3242_s21 + $0x9] sm:$0xff]  ;;  %v305_v33 = vld [vmem:[%s3242_s21 + $0x1] sm:$0xff]  ;;  %v3467_v44 = vld [vmem:[%s3242_s21 + $0x32] sm:$0xff] }
  0x22   : > { %v403_v37 = vld [vmem:[%s3242_s21 + $0x8] sm:$0xff]  ;;  %v3441_v38 = vld [vmem:[%s3242_s21 + $0x1a] sm:$0xff]  ;;  %v3496_v47 = vld [vmem:[%s3242_s21 + $0x52] sm:$0xff] }
  0x23   : > { %v3448_v39 = vld [vmem:[%s3242_s21 + $0x22] sm:$0xff]  ;;  %v953_v43 = vld [vmem:[%s3242_s21 + $0xa] sm:$0xff]  ;;  %v3474_v45 = vld [vmem:[%s3242_s21 + $0x3a] sm:$0xff] }
  0x24   : > { %256 = vrot.lane.b32.xlu1 %v3340_v19, %s3185_s22  ;;  %254 = vrot.lane.b32.xlu0 %v3343_v20, %s3185_s22  ;;  %v952_v42 = vld [vmem:[%s3242_s21 + $0x2] sm:$0xff]  ;;  %v3489_v46 = vld [vmem:[%s3242_s21 + $0x4a] sm:$0xff] }
  0x25   : > { %v3511_v48 = vld [vmem:[%s3242_s21 + $0x62] sm:$0xff]  ;;  %v3520_v51 = vld [vmem:[%s3242_s21 + $0x6a] sm:$0xff]  ;;  %v3550_v61 = vld [vmem:[%s3242_s21 + $0x7a] sm:$0xff] }
  0x26   : > { %v3547_v60 = vld [vmem:[%s3242_s21 + $0x82] sm:$0xff] }
  0x28   : > { %260 = vrot.lane.b32.xlu1 %v3373_v26, %s3185_s22  ;;  %258 = vrot.lane.b32.xlu0 %v3376_v27, %s3185_s22 }
  0x2c   : > { %264 = vrot.lane.b32.xlu1 %v3385_v28, %s3185_s22  ;;  %262 = vrot.lane.b32.xlu0 %v3388_v29, %s3185_s22 }
  0x30   : > { %268 = vrot.lane.b32.xlu1 %v2649_v30, %s3185_s22  ;;  %266 = vrot.lane.b32.xlu0 %v2648_v31, %s3185_s22 }
  0x34   : > { %339 = vrot.lane.b32.xlu1 %v306_v32, %s3186_s23  ;;  %337 = vrot.lane.b32.xlu0 %v305_v33, %s3186_s23 }
  0x38   : > { %343 = vrot.lane.b32.xlu1 %v3271_v6, %s3186_s23  ;;  %341 = vrot.lane.b32.xlu0 %v3274_v7, %s3186_s23 }
  0x3c   : > { %347 = vrot.lane.b32.xlu1 %v3277_v8, %s3186_s23  ;;  %345 = vrot.lane.b32.xlu0 %v3280_v9, %s3186_s23 }
  0x40   : > { %351 = vrot.lane.b32.xlu1 %v3288_v11, %s3186_s23  ;;  %349 = vrot.lane.b32.xlu0 %v3291_v12, %s3186_s23 }
  0x44   : > { %355 = vrot.lane.b32.xlu1 %v3294_v13, %s3186_s23  ;;  %353 = vrot.lane.b32.xlu0 %v3307_v14, %s3186_s23 }
  0x48   : > { %359 = vrot.lane.b32.xlu1 %v3310_v15, %s3186_s23  ;;  %357 = vrot.lane.b32.xlu0 %v3322_v17, %s3186_s23 }
  0x4c   : > { %434 = vrot.lane.b32.xlu1 %v402_v36, %s3187_s28  ;;  %361 = vrot.lane.b32.xlu0 %v3325_v18, %s3186_s23  ;;  %v3583_v36 = vld [vmem:[%s3242_s21 + $0x9a] sm:$0xff] }
  0x50   : > { %438 = vrot.lane.b32.xlu1 %v3248_v1, %s3187_s28  ;;  %436 = vrot.lane.b32.xlu0 %v403_v37, %s3187_s28  ;;  %v3586_v37 = vld [vmem:[%s3242_s21 + $0x92] sm:$0xff] }
  0x54   : > { %442 = vrot.lane.b32.xlu1 %v3245_v0, %s3187_s28  ;;  %440 = vrot.lane.b32.xlu0 %v3258_v3, %s3187_s28 }
  0x58   : > { %792 = vrot.lane.b32.xlu1 %v3441_v38, %s3185_s22  ;;  %444 = vrot.lane.b32.xlu0 %v3255_v2, %s3187_s28 }
  0x5c   : > { %888 = vrot.lane.b32.xlu1 %v305_v33, %s3186_s23  ;;  %794 = vrot.lane.b32.xlu0 %v3448_v39, %s3185_s22 }
  0x60   : > { %984 = vrot.lane.b32.xlu1 %v952_v42, %s3187_s28  ;;  %890 = vrot.lane.b32.xlu0 %v306_v32, %s3186_s23 }
  0x64   : > { %986 = vrot.lane.b32.xlu1 %v953_v43, %s3187_s28  ;;  %446 = vrot.lane.b32.xlu0 %v3268_v5, %s3187_s28 }
  0x68   : > { %796 = vrot.lane.b32.xlu1 %v3467_v44, %s3185_s22  ;;  %448 = vrot.lane.b32.xlu0 %v3265_v4, %s3187_s28 }
  0x6c   : > { %892 = vrot.lane.b32.xlu1 %v3274_v7, %s3186_s23  ;;  %798 = vrot.lane.b32.xlu0 %v3474_v45, %s3185_s22 }
  0x70   : > { %988 = vrot.lane.b32.xlu1 %v3441_v38, %s3187_s28  ;;  %894 = vrot.lane.b32.xlu0 %v3271_v6, %s3186_s23 }
  0x74   : > { %990 = vrot.lane.b32.xlu1 %v3448_v39, %s3187_s28  ;;  %450 = vrot.lane.b32.xlu0 %v3319_v16, %s3187_s28 }
  0x78   : > { %800 = vrot.lane.b32.xlu1 %v3489_v46, %s3185_s22  ;;  %452 = vrot.lane.b32.xlu0 %v3285_v10, %s3187_s28 }
  0x7c   : > { %896 = vrot.lane.b32.xlu1 %v3280_v9, %s3186_s23  ;;  %802 = vrot.lane.b32.xlu0 %v3496_v47, %s3185_s22 }
  0x80   : > { %992 = vrot.lane.b32.xlu1 %v3467_v44, %s3187_s28  ;;  %898 = vrot.lane.b32.xlu0 %v3277_v8, %s3186_s23 }
  0x84   : > { %994 = vrot.lane.b32.xlu1 %v3474_v45, %s3187_s28  ;;  %454 = vrot.lane.b32.xlu0 %v3343_v20, %s3187_s28 }
  0x86   : > { %v243_v49 = vpop.permute.xlu1 %242  ;;  %v239_v50 = vpop.permute.xlu0 %238 }
  0x87   : > { %289 = vst.msk [vmem:[#allocation2 + $0x10] sm:$0xff] %vm286_vm1, %v243_v49  ;;  %287 = vst.msk [vmem:[#allocation2] sm:$0xff] %vm286_vm1, %v239_v50 }
  0x88   : > { %804 = vrot.lane.b32.xlu1 %v3511_v48, %s3185_s22  ;;  %456 = vrot.lane.b32.xlu0 %v3340_v19, %s3187_s28 }
  0x8a   : > { %v245_v52 = vpop.permute.xlu1 %244  ;;  %v241_v53 = vpop.permute.xlu0 %240 }
  0x8b   : > { %290 = vst.msk [vmem:[#allocation2 + $0x18] sm:$0xff] %vm286_vm1, %v245_v52  ;;  %288 = vst.msk [vmem:[#allocation2 + $0x8] sm:$0xff] %vm286_vm1, %v241_v53  ;;  %v2784_v53 = vld [vmem:[%s4402_s1 + $0x28] sm:$0xff] }
  0x8c   : > { %900 = vrot.lane.b32.xlu1 %v3291_v12, %s3186_s23  ;;  %806 = vrot.lane.b32.xlu0 %v3520_v51, %s3185_s22 }
  0x8d   : > { %3045 = vmatprep.subr.mxu0 %v2784_v53 }
  0x8e   : > { %v249_v54 = vpop.permute.xlu1 %248  ;;  %v247_v55 = vpop.permute.xlu0 %246 }
  0x8f   : > { %292 = vst.msk [vmem:[#allocation2 + $0x28] sm:$0xff] %vm286_vm1, %v249_v54  ;;  %291 = vst.msk [vmem:[#allocation2 + $0x20] sm:$0xff] %vm286_vm1, %v247_v55  ;;  %v3622_v54 = vld [vmem:[%s3242_s21 + $0xaa] sm:$0xff] }
  0x90   : > { %996 = vrot.lane.b32.xlu1 %v3489_v46, %s3187_s28  ;;  %902 = vrot.lane.b32.xlu0 %v3288_v11, %s3186_s23 }
  0x92   : > { %v253_v56 = vpop.permute.xlu1 %252  ;;  %v251_v57 = vpop.permute.xlu0 %250 }
  0x93   : > { %294 = vst.msk [vmem:[#allocation2 + $0x38] sm:$0xff] %vm286_vm1, %v253_v56  ;;  %293 = vst.msk [vmem:[#allocation2 + $0x30] sm:$0xff] %vm286_vm1, %v251_v57  ;;  %v3631_v56 = vld [vmem:[%s3242_s21 + $0xb2] sm:$0xff] }
  0x94   : > { %458 = vrot.lane.b32.xlu1 %v3376_v27, %s3187_s28  ;;  %363 = vrot.lane.b32.xlu0 %v3346_v21, %s3186_s23 }
  0x96   : > { %v257_v58 = vpop.permute.xlu1 %256  ;;  %v255_v59 = vpop.permute.xlu0 %254 }
  0x97   : > { %296 = vst.msk [vmem:[#allocation2 + $0x48] sm:$0xff] %vm286_vm1, %v257_v58  ;;  %295 = vst.msk [vmem:[#allocation2 + $0x40] sm:$0xff] %vm286_vm1, %v255_v59 }
  0x98   : > { %460 = vrot.lane.b32.xlu1 %v3373_v26, %s3187_s28  ;;  %998 = vrot.lane.b32.xlu0 %v3496_v47, %s3187_s28 }
  0x9a   : > { %v261_v62 = vpop.permute.xlu1 %260  ;;  %v259_v63 = vpop.permute.xlu0 %258 }
  0x9b   : > { %298 = vst.msk [vmem:[#allocation2 + $0x58] sm:$0xff] %vm286_vm1, %v261_v62  ;;  %297 = vst.msk [vmem:[#allocation2 + $0x50] sm:$0xff] %vm286_vm1, %v259_v63 }
  0x9c   : > { %810 = vrot.lane.b32.xlu1 %v3547_v60, %s3185_s22  ;;  %808 = vrot.lane.b32.xlu0 %v3550_v61, %s3185_s22 }
  0x9e   : > { %v265_v26 = vpop.permute.xlu1 %264  ;;  %v263_v27 = vpop.permute.xlu0 %262 }
  0x9f   : > { %300 = vst.msk [vmem:[#allocation2 + $0x68] sm:$0xff] %vm286_vm1, %v265_v26  ;;  %299 = vst.msk [vmem:[#allocation2 + $0x60] sm:$0xff] %vm286_vm1, %v263_v27 }
  0xa0   : > { %365 = vrot.lane.b32.xlu1 %v3354_v23, %s3186_s23  ;;  %904 = vrot.lane.b32.xlu0 %v3307_v14, %s3186_s23 }
  0xa2   : > { %v269_v30 = vpop.permute.xlu1 %268  ;;  %v267_v31 = vpop.permute.xlu0 %266 }
  0xa3   : > { %302 = vst.msk [vmem:[#allocation2 + $0x78] sm:$0xff] %vm286_vm1, %v269_v30  ;;  %301 = vst.msk [vmem:[#allocation2 + $0x70] sm:$0xff] %vm286_vm1, %v267_v31 }
  0xa4   : > { %1000 = vrot.lane.b32.xlu1 %v3511_v48, %s3187_s28  ;;  %906 = vrot.lane.b32.xlu0 %v3294_v13, %s3186_s23 }
  0xa6   : > { %v340_v32 = vpop.permute.xlu1 %339  ;;  %v338_v33 = vpop.permute.xlu0 %337 }
  0xa7   : > { %387 = vst.msk [vmem:[#allocation2 + $0x8] sm:$0xff] %vm385_vm2, %v340_v32  ;;  %386 = vst.msk [vmem:[#allocation2] sm:$0xff] %vm385_vm2, %v338_v33 }
  0xa8   : > { %462 = vrot.lane.b32.xlu1 %v3388_v29, %s3187_s28  ;;  %367 = vrot.lane.b32.xlu0 %v3351_v22, %s3186_s23 }
  0xaa   : > { %v344_v34 = vpop.permute.xlu1 %343  ;;  %v342_v35 = vpop.permute.xlu0 %341 }
  0xab   : > { %389 = vst.msk [vmem:[#allocation2 + $0x18] sm:$0xff] %vm385_vm2, %v344_v34  ;;  %388 = vst.msk [vmem:[#allocation2 + $0x10] sm:$0xff] %vm385_vm2, %v342_v35 }
  0xac   : > { %464 = vrot.lane.b32.xlu1 %v3385_v28, %s3187_s28  ;;  %1002 = vrot.lane.b32.xlu0 %v3520_v51, %s3187_s28 }
  0xae   : > { %v348_v29 = vpop.permute.xlu1 %347  ;;  %v346_v40 = vpop.permute.xlu0 %345 }
  0xaf   : > { %391 = vst.msk [vmem:[#allocation2 + $0x28] sm:$0xff] %vm385_vm2, %v348_v29  ;;  %390 = vst.msk [vmem:[#allocation2 + $0x20] sm:$0xff] %vm385_vm2, %v346_v40  ;;  %v3685_v40 = vld [vmem:[%s3242_s21 + $0x19] sm:$0xff] }
  0xb0   : > { %814 = vrot.lane.b32.xlu1 %v3583_v36, %s3185_s22  ;;  %812 = vrot.lane.b32.xlu0 %v3586_v37, %s3185_s22 }
  0xb2   : > { %v352_v28 = vpop.permute.xlu1 %351  ;;  %v350_v41 = vpop.permute.xlu0 %349 }
  0xb3   : > { %393 = vst.msk [vmem:[#allocation2 + $0x38] sm:$0xff] %vm385_vm2, %v352_v28  ;;  %392 = vst.msk [vmem:[#allocation2 + $0x30] sm:$0xff] %vm385_vm2, %v350_v41  ;;  %v3688_v28 = vld [vmem:[%s3242_s21 + $0xc2] sm:$0xff] }
  0xb4   : > { %1405 = vrot.lane.b32.xlu1 %v3248_v1, %s3185_s22  ;;  %908 = vrot.lane.b32.xlu0 %v3322_v17, %s3186_s23 }
  0xb6   : > { %v356_v42 = vpop.permute.xlu1 %355  ;;  %v354_v43 = vpop.permute.xlu0 %353 }
  0xb7   : > { %395 = vst.msk [vmem:[#allocation2 + $0x48] sm:$0xff] %vm385_vm2, %v356_v42  ;;  %394 = vst.msk [vmem:[#allocation2 + $0x40] sm:$0xff] %vm385_vm2, %v354_v43  ;;  %v3703_v43 = vld [vmem:[%s3242_s21 + $0xca] sm:$0xff] }
  0xb8   : > { %1004 = vrot.lane.b32.xlu1 %v3550_v61, %s3187_s28  ;;  %910 = vrot.lane.b32.xlu0 %v3310_v15, %s3186_s23 }
  0xba   : > { %v360_v49 = vpop.permute.xlu1 %359  ;;  %v358_v50 = vpop.permute.xlu0 %357 }
  0xbb   : > { %397 = vst.msk [vmem:[#allocation2 + $0x58] sm:$0xff] %vm385_vm2, %v360_v49  ;;  %396 = vst.msk [vmem:[#allocation2 + $0x50] sm:$0xff] %vm385_vm2, %v358_v50 }
  0xbc   : > { %1504 = vrot.lane.b32.xlu1 %v3280_v9, %s3186_s23  ;;  %1407 = vrot.lane.b32.xlu0 %v3258_v3, %s3185_s22 }
  0xbe   : > { %v435_v1 = vpop.permute.xlu1 %434  ;;  %v362_v52 = vpop.permute.xlu0 %361 }
  0xbf   : > { %483 = vst.msk [vmem:[#allocation2] sm:$0xff] %vm482_vm3, %v435_v1 }
  0xc0   : > { %398 = vst.msk [vmem:[#allocation2 + $0x60] sm:$0xff] %vm385_vm2, %v362_v52  ;;  %1506 = vrot.lane.b32.xlu1 %v3277_v8, %s3186_s23  ;;  %1006 = vrot.lane.b32.xlu0 %v3547_v60, %s3187_s28 }
  0xc2   : > { %v439_v3 = vpop.permute.xlu1 %438  ;;  %v437_v55 = vpop.permute.xlu0 %436 }
  0xc3   : > { %485 = vst.msk [vmem:[#allocation2 + $0x10] sm:$0xff] %vm482_vm3, %v439_v3  ;;  %484 = vst.msk [vmem:[#allocation2 + $0x8] sm:$0xff] %vm482_vm3, %v437_v55 }
  0xc4   : > { %816 = vrot.lane.b32.xlu1 %v3622_v54, %s3185_s22  ;;  %1600 = vrot.lane.b32.xlu0 %v3245_v0, %s3187_s28 }
  0xc6   : > { %v443_v57 = vpop.permute.xlu1 %442  ;;  %v441_v58 = vpop.permute.xlu0 %440  ;;  %v499_v59 = vld [vmem:[#allocation2] sm:$0xff] }
  0xc7   : > { %487 = vst.msk [vmem:[#allocation2 + $0x20] sm:$0xff] %vm482_vm3, %v443_v57  ;;  %486 = vst.msk [vmem:[#allocation2 + $0x18] sm:$0xff] %vm482_vm3, %v441_v58  ;;  %2993 = vmatprep.mubr.msk.f32.mxu0 %vm517_vm4, %v499_v59  ;;  %v3733_v59 = vld [vmem:[%s3242_s21 + $0x31] sm:$0xff] }
  0xc8   : > { %744 = vst.msk [vmem:[#allocation2] sm:$0xff] %vm189_vm0, %v3274_v7  ;;  %818 = vrot.lane.b32.xlu1 %v3631_v56, %s3185_s22  ;;  %1602 = vrot.lane.b32.xlu0 %v3255_v2, %s3187_s28  ;;  %v2783_v7 = vld [vmem:[%s4402_s1 + $0x20] sm:$0xff] }
  0xca   : > { %v793_v62 = vpop.permute.xlu1 %792  ;;  %v445_v63 = vpop.permute.xlu0 %444  ;;  %v500_v26 = vld [vmem:[#allocation2 + $0x8] sm:$0xff]  ;;  %v501_v27 = vld [vmem:[#allocation2 + $0x10] sm:$0xff] }
  0xcb   : > { %840 = vst.msk [vmem:[#allocation2] sm:$0xff] %vm286_vm1, %v793_v62  ;;  %2994 = vmatmul.mubr.msk.f32.vlgmr.msra.gmra.mxu0 %vm517_vm4, %v500_v26  ;;  %v3745_v26 = vld [vmem:[%s3242_s21 + $0x39] sm:$0xff] }
  0xcc   : > { %488 = vst.msk [vmem:[#allocation2 + $0x28] sm:$0xff] %vm482_vm3, %v445_v63  ;;  %1409 = vrot.lane.b32.xlu1 %v3245_v0, %s3185_s22  ;;  %912 = vrot.lane.b32.xlu0 %v3325_v18, %s3186_s23 }
  0xcd   : > { %745 = vst.msk [vmem:[#allocation2 + $0x8] sm:$0xff] %vm189_vm0, %v3271_v6  ;;  %746 = vst.msk [vmem:[#allocation2 + $0x10] sm:$0xff] %vm189_vm0, %v3280_v9  ;;  %2996 = vmatprep.mubr.msk.f32.mxu0 %vm517_vm4, %v501_v27  ;;  %3046 = vmatpush3.msra.mxu0 %v2784_v53 }
  0xce   : > { %v889_v30 = vpop.permute.xlu1 %888  ;;  %v795_v31 = vpop.permute.xlu0 %794  ;;  %v502_v32 = vld [vmem:[#allocation2 + $0x18] sm:$0xff]  ;;  %v503_v6 = vld [vmem:[#allocation2 + $0x20] sm:$0xff]  ;;  %3047 = vmatprep.subr.mxu0 %v2783_v7 }
  0xcf   : > { %936 = vst.msk [vmem:[#allocation2] sm:$0xff] %vm385_vm2, %v889_v30  ;;  %2997 = vmatmul.mubr.msk.f32.gmra.mxu0 %vm517_vm4, %v502_v32 }
  0xd0   : > { %841 = vst.msk [vmem:[#allocation2 + $0x8] sm:$0xff] %vm286_vm1, %v795_v31  ;;  %1008 = vrot.lane.b32.xlu1 %v3586_v37, %s3187_s28  ;;  %914 = vrot.lane.b32.xlu0 %v3346_v21, %s3186_s23 }
  0xd1   : > { %747 = vst.msk [vmem:[#allocation2 + $0x18] sm:$0xff] %vm189_vm0, %v3277_v8  ;;  %748 = vst.msk [vmem:[#allocation2 + $0x20] sm:$0xff] %vm189_vm0, %v3291_v12  ;;  %2999 = vmatprep.mubr.msk.f32.mxu0 %vm517_vm4, %v503_v6  ;;  %3048 = vmatpush3.msra.mxu0 %v2783_v7 }
  0xd2   : > { %v985_v0 = vpop.permute.xlu1 %984  ;;  %v891_v33 = vpop.permute.xlu0 %890 }
  0xd3   : > { %v504_v34 = vld [vmem:[#allocation2 + $0x28] sm:$0xff]  ;;  %1032 = vst.msk [vmem:[#allocation2] sm:$0xff] %vm482_vm3, %v985_v0 }
  0xd4   : > { %937 = vst.msk [vmem:[#allocation2 + $0x8] sm:$0xff] %vm385_vm2, %v891_v33  ;;  %3000 = vmatmul.mubr.msk.f32.gmra.mxu0 %vm517_vm4, %v504_v34  ;;  %1508 = vrot.lane.b32.xlu1 %v3291_v12, %s3186_s23  ;;  %v3775_v0 = vld [vmem:[%s3242_s21 + $0x49] sm:$0xff] }
  0xd5   : > { %749 = vst.msk [vmem:[#allocation2 + $0x28] sm:$0xff] %vm189_vm0, %v3288_v11  ;;  %1411 = vrot.lane.b32.xlu0 %v3255_v2, %s3185_s22 }
  0xd6   : > { %v987_v35 = vpop.permute.xlu1 %986  ;;  %v447_v29 = vpop.permute.xlu0 %446 }
  0xd7   : > { %1033 = vst.msk [vmem:[#allocation2 + $0x8] sm:$0xff] %vm482_vm3, %v987_v35  ;;  %489 = vst.msk [vmem:[#allocation2 + $0x30] sm:$0xff] %vm482_vm3, %v447_v29 }
  0xd8   : > { %1510 = vrot.lane.b32.xlu1 %v3288_v11, %s3186_s23 }
  0xd9   : > { %1010 = vrot.lane.b32.xlu0 %v3583_v36, %s3187_s28  ;;  %v3700_v36 = vld [vmem:[%s3242_s21 + $0x21] sm:$0xff] }
  0xda   : > { %v797_v41 = vpop.permute.xlu1 %796  ;;  %v449_v2 = vpop.permute.xlu0 %448  ;;  %v1048_v42 = vld [vmem:[#allocation2] sm:$0xff] }
  0xdb   : > { %842 = vst.msk [vmem:[#allocation2 + $0x10] sm:$0xff] %vm286_vm1, %v797_v41  ;;  %3021 = vmatprep.mubr.msk.f32.mxu1 %vm517_vm4, %v1048_v42 }
  0xdc   : > { %490 = vst.msk [vmem:[#allocation2 + $0x38] sm:$0xff] %vm482_vm3, %v449_v2  ;;  %820 = vrot.lane.b32.xlu1 %v3688_v28, %s3185_s22 }
  0xdd   : > { %1357 = vst.msk [vmem:[#allocation2] sm:$0xff] %vm189_vm0, %v3685_v40  ;;  %1604 = vrot.lane.b32.xlu0 %v3268_v5, %s3187_s28 }
  0xde   : > { %v893_v49 = vpop.permute.xlu1 %892  ;;  %v799_v50 = vpop.permute.xlu0 %798  ;;  %v505_v1 = vld [vmem:[#allocation2 + $0x30] sm:$0xff]  ;;  %v1049_v52 = vld [vmem:[#allocation2 + $0x8] sm:$0xff] }
  0xdf   : > { %938 = vst.msk [vmem:[#allocation2 + $0x10] sm:$0xff] %vm385_vm2, %v893_v49  ;;  %3002 = vmatprep.mubr.msk.f32.mxu0 %vm517_vm4, %v505_v1  ;;  %3022 = vmatmul.mubr.msk.f32.vlgmr.msra.gmra.mxu1 %vm517_vm4, %v1049_v52  ;;  %v2882_v49 = vld [vmem:[%s4402_s1 + $0x38] sm:$0xff] }
  0xe0   : > { %843 = vst.msk [vmem:[#allocation2 + $0x18] sm:$0xff] %vm286_vm1, %v799_v50  ;;  %822 = vrot.lane.b32.xlu1 %v3703_v43, %s3185_s22  ;;  %3073 = vmatprep.subr.mxu1 %v2882_v49 }
  0xe1   : > { %750 = vst.msk [vmem:[#allocation2 + $0x30] sm:$0xff] %vm189_vm0, %v3307_v14  ;;  %1358 = vst.msk [vmem:[#allocation2 + $0x8] sm:$0xff] %vm189_vm0, %v3700_v36  ;;  %1606 = vrot.lane.b32.xlu0 %v3265_v4, %s3187_s28  ;;  %3074 = vmatpush3.msra.mxu1 %v2882_v49 }
  0xe2   : > { %v989_v53 = vpop.permute.xlu1 %988  ;;  %v895_v3 = vpop.permute.xlu0 %894 }
  0xe3   : > { %v506_v55 = vld [vmem:[#allocation2 + $0x38] sm:$0xff]  ;;  %1034 = vst.msk [vmem:[#allocation2 + $0x10] sm:$0xff] %vm482_vm3, %v989_v53  ;;  %v3823_v53 = vld [vmem:[%s3242_s21 + $0x61] sm:$0xff] }
  0xe4   : > { %939 = vst.msk [vmem:[#allocation2 + $0x18] sm:$0xff] %vm385_vm2, %v895_v3  ;;  %3003 = vmatmul.mubr.msk.f32.gmra.mxu0 %vm517_vm4, %v506_v55  ;;  %1413 = vrot.lane.b32.xlu1 %v3268_v5, %s3185_s22 }
  0xe5   : > { %751 = vst.msk [vmem:[#allocation2 + $0x38] sm:$0xff] %vm189_vm0, %v3294_v13  ;;  %916 = vrot.lane.b32.xlu0 %v3354_v23, %s3186_s23 }
  0xe6   : > { %v991_v57 = vpop.permute.xlu1 %990  ;;  %v451_v58 = vpop.permute.xlu0 %450 }
  0xe7   : > { %1035 = vst.msk [vmem:[#allocation2 + $0x18] sm:$0xff] %vm482_vm3, %v991_v57  ;;  %491 = vst.msk [vmem:[#allocation2 + $0x40] sm:$0xff] %vm482_vm3, %v451_v58 }
  0xe8   : > { %1012 = vrot.lane.b32.xlu1 %v3622_v54, %s3187_s28 }
  0xe9   : > { %918 = vrot.lane.b32.xlu0 %v3351_v22, %s3186_s23 }
  0xea   : > { %v801_v62 = vpop.permute.xlu1 %800  ;;  %v453_v5 = vpop.permute.xlu0 %452  ;;  %v1050_v63 = vld [vmem:[#allocation2 + $0x10] sm:$0xff] }
  0xeb   : > { %844 = vst.msk [vmem:[#allocation2 + $0x20] sm:$0xff] %vm286_vm1, %v801_v62  ;;  %3024 = vmatprep.mubr.msk.f32.mxu1 %vm517_vm4, %v1050_v63  ;;  %v3844_v63 = vld [vmem:[%s3242_s21 + $0x69] sm:$0xff] }
  0xec   : > { %492 = vst.msk [vmem:[#allocation2 + $0x48] sm:$0xff] %vm482_vm3, %v453_v5  ;;  %1512 = vrot.lane.b32.xlu1 %v3307_v14, %s3186_s23 }
  0xed   : > { %1359 = vst.msk [vmem:[#allocation2 + $0x10] sm:$0xff] %vm189_vm0, %v3733_v59  ;;  %1415 = vrot.lane.b32.xlu0 %v3265_v4, %s3185_s22 }
  0xee   : > { %v897_v27 = vpop.permute.xlu1 %896  ;;  %v803_v7 = vpop.permute.xlu0 %802  ;;  %v507_v30 = vld [vmem:[#allocation2 + $0x40] sm:$0xff]  ;;  %v1051_v31 = vld [vmem:[#allocation2 + $0x18] sm:$0xff] }
  0xef   : > { %940 = vst.msk [vmem:[#allocation2 + $0x20] sm:$0xff] %vm385_vm2, %v897_v27  ;;  %3005 = vmatprep.mubr.msk.f32.mxu0 %vm517_vm4, %v507_v30  ;;  %3025 = vmatmul.mubr.msk.f32.gmra.mxu1 %vm517_vm4, %v1051_v31  ;;  %v3872_v31 = vld [vmem:[%s3242_s21 + $0x79] sm:$0xff] }
  0xf0   : > { %845 = vst.msk [vmem:[#allocation2 + $0x28] sm:$0xff] %vm286_vm1, %v803_v7  ;;  %1514 = vrot.lane.b32.xlu1 %v3294_v13, %s3186_s23 }
  0xf1   : > { %752 = vst.msk [vmem:[#allocation2 + $0x40] sm:$0xff] %vm189_vm0, %v3322_v17  ;;  %1360 = vst.msk [vmem:[#allocation2 + $0x18] sm:$0xff] %vm189_vm0, %v3745_v26  ;;  %1014 = vrot.lane.b32.xlu0 %v3631_v56, %s3187_s28 }
  0xf2   : > { %v993_v4 = vpop.permute.xlu1 %992  ;;  %v899_v14 = vpop.permute.xlu0 %898 }
  0xf3   : > { %v508_v32 = vld [vmem:[#allocation2 + $0x48] sm:$0xff]  ;;  %1036 = vst.msk [vmem:[#allocation2 + $0x20] sm:$0xff] %vm482_vm3, %v993_v4 }
  0xf4   : > { %941 = vst.msk [vmem:[#allocation2 + $0x28] sm:$0xff] %vm385_vm2, %v899_v14  ;;  %3006 = vmatmul.mubr.msk.f32.gmra.mxu0 %vm517_vm4, %v508_v32  ;;  %1610 = vrot.lane.b32.xlu1 %v3285_v10, %s3187_s28 }
  0xf5   : > { %753 = vst.msk [vmem:[#allocation2 + $0x48] sm:$0xff] %vm189_vm0, %v3310_v15  ;;  %1608 = vrot.lane.b32.xlu0 %v3319_v16, %s3187_s28 }
  0xf6   : > { %v995_v13 = vpop.permute.xlu1 %994  ;;  %v455_v6 = vpop.permute.xlu0 %454 }
  0xf7   : > { %1037 = vst.msk [vmem:[#allocation2 + $0x28] sm:$0xff] %vm482_vm3, %v995_v13  ;;  %493 = vst.msk [vmem:[#allocation2 + $0x50] sm:$0xff] %vm482_vm3, %v455_v6 }
  0xf8   : > { %1417 = vrot.lane.b32.xlu1 %v3319_v16, %s3185_s22  ;;  %v3787_v16 = vld [vmem:[%s3242_s21 + $0x51] sm:$0xff] }
  0xf9   : > { %1957 = vrot.lane.b32.xlu0 %v3441_v38, %s3185_s22 }
  0xfa   : > { %v805_v33 = vpop.permute.xlu1 %804  ;;  %v457_v34 = vpop.permute.xlu0 %456  ;;  %v1052_v35 = vld [vmem:[#allocation2 + $0x20] sm:$0xff] }
  0xfb   : > { %846 = vst.msk [vmem:[#allocation2 + $0x30] sm:$0xff] %vm286_vm1, %v805_v33  ;;  %3027 = vmatprep.mubr.msk.f32.mxu1 %vm517_vm4, %v1052_v35  ;;  %v3892_v33 = vld [vmem:[%s3242_s21 + $0x81] sm:$0xff] }
  0xfc   : > { %494 = vst.msk [vmem:[#allocation2 + $0x58] sm:$0xff] %vm482_vm3, %v457_v34  ;;  %2053 = vrot.lane.b32.xlu1 %v3280_v9, %s3186_s23 }
  0xfd   : > { %1361 = vst.msk [vmem:[#allocation2 + $0x20] sm:$0xff] %vm189_vm0, %v3775_v0  ;;  %1959 = vrot.lane.b32.xlu0 %v3448_v39, %s3185_s22 }
  0xfe   : > { %v901_v38 = vpop.permute.xlu1 %900  ;;  %v807_v29 = vpop.permute.xlu0 %806  ;;  %v509_v41 = vld [vmem:[#allocation2 + $0x50] sm:$0xff]  ;;  %v1053_v2 = vld [vmem:[#allocation2 + $0x28] sm:$0xff] }
  0xff   : > { %942 = vst.msk [vmem:[#allocation2 + $0x30] sm:$0xff] %vm385_vm2, %v901_v38  ;;  %3008 = vmatprep.mubr.msk.f32.mxu0 %vm517_vm4, %v509_v41  ;;  %3028 = vmatmul.mubr.msk.f32.gmra.mxu1 %vm517_vm4, %v1053_v2 }
 0x100   : > { %847 = vst.msk [vmem:[#allocation2 + $0x38] sm:$0xff] %vm286_vm1, %v807_v29  ;;  %1516 = vrot.lane.b32.xlu1 %v3322_v17, %s3186_s23 }
 0x101   : > { %754 = vst.msk [vmem:[#allocation2 + $0x50] sm:$0xff] %vm189_vm0, %v3325_v18  ;;  %1362 = vst.msk [vmem:[#allocation2 + $0x28] sm:$0xff] %vm189_vm0, %v3787_v16  ;;  %1419 = vrot.lane.b32.xlu0 %v3285_v10, %s3185_s22  ;;  %v2881_v10 = vld [vmem:[%s4402_s1 + $0x30] sm:$0xff] }
 0x102   : > { %v997_v9 = vpop.permute.xlu1 %996  ;;  %v903_v39 = vpop.permute.xlu0 %902  ;;  %3075 = vmatprep.subr.mxu1 %v2881_v10 }
 0x103   : > { %v510_v42 = vld [vmem:[#allocation2 + $0x58] sm:$0xff]  ;;  %1038 = vst.msk [vmem:[#allocation2 + $0x30] sm:$0xff] %vm482_vm3, %v997_v9  ;;  %3076 = vmatpush3.msra.mxu1 %v2881_v10 }
 0x104   : > { %943 = vst.msk [vmem:[#allocation2 + $0x38] sm:$0xff] %vm385_vm2, %v903_v39  ;;  %3009 = vmatmul.mubr.msk.f32.gmra.mxu0 %vm517_vm4, %v510_v42  ;;  %2149 = vrot.lane.b32.xlu1 %v3467_v44, %s3187_s28  ;;  %v3917_v9 = vld [vmem:[%s3242_s21 + $0x91] sm:$0xff] }
 0x105   : > { %755 = vst.msk [vmem:[#allocation2 + $0x58] sm:$0xff] %vm189_vm0, %v3346_v21  ;;  %2055 = vrot.lane.b32.xlu0 %v3277_v8, %s3186_s23  ;;  %v2778_v42 = vld [vmem:[%s3242_s21 + $0xb0] sm:$0xff] }
 0x106   : > { %v459_v17 = vpop.permute.xlu1 %458  ;;  %v364_v50 = vpop.permute.xlu0 %363 }
 0x107   : > { %495 = vst.msk [vmem:[#allocation2 + $0x60] sm:$0xff] %vm482_vm3, %v459_v17 }
 0x108   : > { %399 = vst.msk [vmem:[#allocation2 + $0x68] sm:$0xff] %vm385_vm2, %v364_v50  ;;  %1612 = vrot.lane.b32.xlu1 %v3343_v20, %s3187_s28  ;;  %v3936_v50 = vld [vmem:[%s3242_s21 + $0x99] sm:$0xff] }
 0x109   : > { %1518 = vrot.lane.b32.xlu0 %v3310_v15, %s3186_s23 }
 0x10a   : > { %v461_v8 = vpop.permute.xlu1 %460  ;;  %v999_v1 = vpop.permute.xlu0 %998  ;;  %v1054_v52 = vld [vmem:[#allocation2 + $0x30] sm:$0xff] }
 0x10b   : > { %496 = vst.msk [vmem:[#allocation2 + $0x68] sm:$0xff] %vm482_vm3, %v461_v8  ;;  %1039 = vst.msk [vmem:[#allocation2 + $0x38] sm:$0xff] %vm482_vm3, %v999_v1  ;;  %3030 = vmatprep.mubr.msk.f32.mxu1 %vm517_vm4, %v1054_v52 }
 0x10c   : > { %1363 = vst.msk [vmem:[#allocation2 + $0x30] sm:$0xff] %vm189_vm0, %v3823_v53  ;;  %1614 = vrot.lane.b32.xlu1 %v3340_v19, %s3187_s28 }
 0x10d   : > { %2151 = vrot.lane.b32.xlu0 %v3474_v45, %s3187_s28 }
 0x10e   : > { %v811_v15 = vpop.permute.xlu1 %810  ;;  %v809_v3 = vpop.permute.xlu0 %808  ;;  %v511_v55 = vld [vmem:[#allocation2 + $0x60] sm:$0xff] }
 0x10f   : > { %849 = vst.msk [vmem:[#allocation2 + $0x48] sm:$0xff] %vm286_vm1, %v811_v15  ;;  %848 = vst.msk [vmem:[#allocation2 + $0x40] sm:$0xff] %vm286_vm1, %v809_v3  ;;  %3011 = vmatprep.mubr.msk.f32.mxu0 %vm517_vm4, %v511_v55 }
 0x110   : > { %756 = vst.msk [vmem:[#allocation2 + $0x60] sm:$0xff] %vm189_vm0, %v3354_v23  ;;  %1421 = vrot.lane.b32.xlu1 %v3343_v20, %s3185_s22 }
 0x111   : > { %1961 = vrot.lane.b32.xlu0 %v3467_v44, %s3185_s22 }
 0x112   : > { %v366_v57 = vpop.permute.xlu1 %365  ;;  %v905_v58 = vpop.permute.xlu0 %904  ;;  %v512_v62 = vld [vmem:[#allocation2 + $0x68] sm:$0xff]  ;;  %v1055_v5 = vld [vmem:[#allocation2 + $0x38] sm:$0xff] }
 0x113   : > { %400 = vst.msk [vmem:[#allocation2 + $0x70] sm:$0xff] %vm385_vm2, %v366_v57  ;;  %944 = vst.msk [vmem:[#allocation2 + $0x40] sm:$0xff] %vm385_vm2, %v905_v58  ;;  %3012 = vmatmul.mubr.msk.f32.gmra.mxu0 %vm517_vm4, %v512_v62  ;;  %3031 = vmatmul.mubr.msk.f32.gmra.mxu1 %vm517_vm4, %v1055_v5  ;;  %v3969_v58 = vld [vmem:[%s3242_s21 + $0xa9] sm:$0xff] }
 0x114   : > { %757 = vst.msk [vmem:[#allocation2 + $0x68] sm:$0xff] %vm189_vm0, %v3351_v22  ;;  %1364 = vst.msk [vmem:[#allocation2 + $0x38] sm:$0xff] %vm189_vm0, %v3844_v63  ;;  %2057 = vrot.lane.b32.xlu1 %v3291_v12, %s3186_s23  ;;  %v2775_v12 = vld [vmem:[%s3242_s21 + $0x90] sm:$0xff]  ;;  %v2780_v5 = vld [vmem:[%s3242_s21 + $0xc8] sm:$0xff] }
 0x115   : > { %1963 = vrot.lane.b32.xlu0 %v3474_v45, %s3185_s22 }
 0x116   : > { %v1001_v20 = vpop.permute.xlu1 %1000  ;;  %v907_v44 = vpop.permute.xlu0 %906 }
 0x117   : > { %1040 = vst.msk [vmem:[#allocation2 + $0x40] sm:$0xff] %vm482_vm3, %v1001_v20 }
 0x118   : > { %945 = vst.msk [vmem:[#allocation2 + $0x48] sm:$0xff] %vm385_vm2, %v907_v44  ;;  %1520 = vrot.lane.b32.xlu1 %v3325_v18, %s3186_s23 }
 0x119   : > { %1423 = vrot.lane.b32.xlu0 %v3340_v19, %s3185_s22 }
 0x11a   : > { %v463_v27 = vpop.permute.xlu1 %462  ;;  %v368_v7 = vpop.permute.xlu0 %367 }
 0x11b   : > { %497 = vst.msk [vmem:[#allocation2 + $0x70] sm:$0xff] %vm482_vm3, %v463_v27  ;;  %v3988_v27 = vld [vmem:[%s3242_s21 + $0xb1] sm:$0xff] }
 0x11c   : > { %401 = vst.msk [vmem:[#allocation2 + $0x78] sm:$0xff] %vm385_vm2, %v368_v7  ;;  %2153 = vrot.lane.b32.xlu1 %v3489_v46, %s3187_s28 }
 0x11d   : > { %2059 = vrot.lane.b32.xlu0 %v3288_v11, %s3186_s23  ;;  %v2776_v11 = vld [vmem:[%s3242_s21 + $0x98] sm:$0xff] }
 0x11e   : > { %v465_v45 = vpop.permute.xlu1 %464  ;;  %v1003_v30 = vpop.permute.xlu0 %1002  ;;  %v1056_v18 = vld [vmem:[#allocation2 + $0x40] sm:$0xff] }
 0x11f   : > { %498 = vst.msk [vmem:[#allocation2 + $0x78] sm:$0xff] %vm482_vm3, %v465_v45  ;;  %1041 = vst.msk [vmem:[#allocation2 + $0x48] sm:$0xff] %vm482_vm3, %v1003_v30  ;;  %3033 = vmatprep.mubr.msk.f32.mxu1 %vm517_vm4, %v1056_v18  ;;  %v2842_v30 = vld [vmem:[%s3242_s21 + $0x82] sm:$0xff] }
 0x120   : > { %1365 = vst.msk [vmem:[#allocation2 + $0x40] sm:$0xff] %vm189_vm0, %v3872_v31  ;;  %1616 = vrot.lane.b32.xlu1 %v2775_v12, %s3187_s28 }
 0x121   : > { %1522 = vrot.lane.b32.xlu0 %v3346_v21, %s3186_s23 }
 0x122   : > { %v815_v19 = vpop.permute.xlu1 %814  ;;  %v813_v4 = vpop.permute.xlu0 %812  ;;  %v513_v14 = vld [vmem:[#allocation2 + $0x70] sm:$0xff] }
 0x123   : > { %851 = vst.msk [vmem:[#allocation2 + $0x58] sm:$0xff] %vm286_vm1, %v815_v19  ;;  %850 = vst.msk [vmem:[#allocation2 + $0x50] sm:$0xff] %vm286_vm1, %v813_v4  ;;  %3014 = vmatprep.mubr.msk.f32.mxu0 %vm517_vm4, %v513_v14 }
 0x124   : > { %758 = vst.msk [vmem:[#allocation2 + $0x70] sm:$0xff] %vm189_vm0, %v3370_v25  ;;  %1618 = vrot.lane.b32.xlu1 %v2776_v11, %s3187_s28 }
 0x125   : > { %2155 = vrot.lane.b32.xlu0 %v3496_v47, %s3187_s28 }
 0x126   : > { %v1406_v32 = vpop.permute.xlu1 %1405  ;;  %v909_v21 = vpop.permute.xlu0 %908  ;;  %v514_v13 = vld [vmem:[#allocation2 + $0x78] sm:$0xff]  ;;  %v1057_v6 = vld [vmem:[#allocation2 + $0x48] sm:$0xff] }
 0x127   : > { %1453 = vst.msk [vmem:[#allocation2] sm:$0xff] %vm286_vm1, %v1406_v32  ;;  %3015 = vmatmul.mubr.msk.f32.gmra.mxu0 %vm517_vm4, %v514_v13  ;;  %3034 = vmatmul.mubr.msk.f32.gmra.mxu1 %vm517_vm4, %v1057_v6  ;;  %v2781_v13 = vld [vmem:[%s3242_s21 + $0xd8] sm:$0xff]  ;;  %v4037_v6 = vld [vmem:[%s3242_s21 + $0xe1] sm:$0xff] }
 0x128   : > { %946 = vst.msk [vmem:[#allocation2 + $0x50] sm:$0xff] %vm385_vm2, %v909_v21  ;;  %1425 = vrot.lane.b32.xlu1 %v2775_v12, %s3185_s22  ;;  %v4024_v21 = vld [vmem:[%s3242_s21 + $0xc1] sm:$0xff] }
 0x129   : > { %759 = vst.msk [vmem:[#allocation2 + $0x78] sm:$0xff] %vm189_vm0, %v3357_v24  ;;  %1366 = vst.msk [vmem:[#allocation2 + $0x48] sm:$0xff] %vm189_vm0, %v3892_v33  ;;  %1965 = vrot.lane.b32.xlu0 %v3489_v46, %s3185_s22 }
 0x12a   : > { %v1005_v34 = vpop.permute.xlu1 %1004  ;;  %v911_v35 = vpop.permute.xlu0 %910 }
 0x12b   : > { %1042 = vst.msk [vmem:[#allocation2 + $0x50] sm:$0xff] %vm482_vm3, %v1005_v34 }
 0x12c   : > { %947 = vst.msk [vmem:[#allocation2 + $0x58] sm:$0xff] %vm385_vm2, %v911_v35  ;;  %2061 = vrot.lane.b32.xlu1 %v3823_v53, %s3186_s23 }
 0x12d   : > { %1967 = vrot.lane.b32.xlu0 %v3496_v47, %s3185_s22 }
 0x12e   : > { %v1505_v38 = vpop.permute.xlu1 %1504  ;;  %v1408_v29 = vpop.permute.xlu0 %1407 }
 0x12f   : > { %1552 = vst.msk [vmem:[#allocation2] sm:$0xff] %vm385_vm2, %v1505_v38  ;;  %v2782_v38 = vld [vmem:[%s3242_s21 + $0xe0] sm:$0xff] }
 0x130   : > { %1454 = vst.msk [vmem:[#allocation2 + $0x8] sm:$0xff] %vm286_vm1, %v1408_v29  ;;  %1524 = vrot.lane.b32.xlu1 %v3354_v23, %s3186_s23  ;;  %v2777_v23 = vld [vmem:[%s3242_s21 + $0xa8] sm:$0xff] }
 0x131   : > { %1427 = vrot.lane.b32.xlu0 %v2776_v11, %s3185_s22 }
 0x132   : > { %v1507_v46 = vpop.permute.xlu1 %1506  ;;  %v1007_v41 = vpop.permute.xlu0 %1006  ;;  %v1058_v2 = vld [vmem:[#allocation2 + $0x50] sm:$0xff] }
 0x133   : > { %1553 = vst.msk [vmem:[#allocation2 + $0x8] sm:$0xff] %vm385_vm2, %v1507_v46  ;;  %3036 = vmatprep.mubr.msk.f32.mxu1 %vm517_vm4, %v1058_v2  ;;  %v4047_v2 = vld [vmem:[%s3242_s21 + $0xc9] sm:$0xff] }
 0x134   : > { %1043 = vst.msk [vmem:[#allocation2 + $0x58] sm:$0xff] %vm482_vm3, %v1007_v41  ;;  %2157 = vrot.lane.b32.xlu1 %v3511_v48, %s3187_s28 }
 0x135   : > { %1367 = vst.msk [vmem:[#allocation2 + $0x50] sm:$0xff] %vm189_vm0, %v3917_v9  ;;  %2063 = vrot.lane.b32.xlu0 %v3844_v63, %s3186_s23 }
 0x136   : > { %v817_v47 = vpop.permute.xlu1 %816  ;;  %v1601_v39 = vpop.permute.xlu0 %1600 }
 0x137   : > { %852 = vst.msk [vmem:[#allocation2 + $0x60] sm:$0xff] %vm286_vm1, %v817_v47 }
 0x138   : > { %1648 = vst.msk [vmem:[#allocation2] sm:$0xff] %vm482_vm3, %v1601_v39  ;;  %1620 = vrot.lane.b32.xlu1 %v2777_v23, %s3187_s28 }
 0x139   : > { %1526 = vrot.lane.b32.xlu0 %v3351_v22, %s3186_s23 }
 0x13a   : > { %v819_v49 = vpop.permute.xlu1 %818  ;;  %v1603_v10 = vpop.permute.xlu0 %1602 }
 0x13b   : > { %v1059_v17 = vld [vmem:[#allocation2 + $0x58] sm:$0xff]  ;;  %853 = vst.msk [vmem:[#allocation2 + $0x68] sm:$0xff] %vm286_vm1, %v819_v49 }
 0x13c   : > { %1649 = vst.msk [vmem:[#allocation2 + $0x8] sm:$0xff] %vm482_vm3, %v1603_v10  ;;  %3037 = vmatmul.mubr.msk.f32.gmra.mxu1 %vm517_vm4, %v1059_v17  ;;  %1622 = vrot.lane.b32.xlu1 %v2778_v42, %s3187_s28 }
 0x13d   : > { %1368 = vst.msk [vmem:[#allocation2 + $0x58] sm:$0xff] %vm189_vm0, %v3936_v50  ;;  %2159 = vrot.lane.b32.xlu0 %v3520_v51, %s3187_s28 }
 0x13e   : > { %v1410_v22 = vpop.permute.xlu1 %1409  ;;  %v913_v8 = vpop.permute.xlu0 %912 }
 0x13f   : > { %v1664_v1 = vld [vmem:[#allocation2] sm:$0xff]  ;;  %1455 = vst.msk [vmem:[#allocation2 + $0x10] sm:$0xff] %vm286_vm1, %v1410_v22  ;;  %v2845_v22 = vld [vmem:[%s3242_s21 + $0xaa] sm:$0xff] }
 0x140   : > { %948 = vst.msk [vmem:[#allocation2 + $0x60] sm:$0xff] %vm385_vm2, %v913_v8  ;;  %3049 = vmatprep.mubr.msk.f32.mxu0 %vm517_vm4, %v1664_v1  ;;  %1429 = vrot.lane.b32.xlu1 %v2777_v23, %s3185_s22  ;;  %v2843_v23 = vld [vmem:[%s3242_s21 + $0x92] sm:$0xff] }
 0x141   : > { %1909 = vst.msk [vmem:[#allocation2] sm:$0xff] %vm189_vm0, %v3685_v40  ;;  %1969 = vrot.lane.b32.xlu0 %v3511_v48, %s3185_s22 }
 0x142   : > { %v1009_v52 = vpop.permute.xlu1 %1008  ;;  %v915_v15 = vpop.permute.xlu0 %914 }
 0x143   : > { %v1665_v3 = vld [vmem:[#allocation2 + $0x8] sm:$0xff]  ;;  %1044 = vst.msk [vmem:[#allocation2 + $0x60] sm:$0xff] %vm482_vm3, %v1009_v52 }
 0x144   : > { %949 = vst.msk [vmem:[#allocation2 + $0x68] sm:$0xff] %vm385_vm2, %v915_v15  ;;  %3050 = vmatmul.mubr.msk.f32.vlgmr.msra.gmra.mxu0 %vm517_vm4, %v1665_v3  ;;  %2065 = vrot.lane.b32.xlu1 %v3872_v31, %s3186_s23 }
 0x145   : > { %1910 = vst.msk [vmem:[#allocation2 + $0x8] sm:$0xff] %vm189_vm0, %v3700_v36  ;;  %1971 = vrot.lane.b32.xlu0 %v3520_v51, %s3185_s22 }
 0x146   : > { %v1509_v48 = vpop.permute.xlu1 %1508 }
 0x147   : > { %v1412_v40 = vpop.permute.xlu0 %1411  ;;  %1554 = vst.msk [vmem:[#allocation2 + $0x10] sm:$0xff] %vm385_vm2, %v1509_v48 }
 0x148   : > { %1456 = vst.msk [vmem:[#allocation2 + $0x18] sm:$0xff] %vm286_vm1, %v1412_v40  ;;  %1528 = vrot.lane.b32.xlu1 %v3370_v25, %s3186_s23  ;;  %v2779_v25 = vld [vmem:[%s3242_s21 + $0xc0] sm:$0xff] }
 0x149   : > { %1431 = vrot.lane.b32.xlu0 %v2778_v42, %s3185_s22 }
 0x14a   : > { %v1511_v55 = vpop.permute.xlu1 %1510  ;;  %v1060_v57 = vld [vmem:[#allocation2 + $0x60] sm:$0xff] }
 0x14b   : > { %v1011_v36 = vpop.permute.xlu0 %1010  ;;  %1555 = vst.msk [vmem:[#allocation2 + $0x18] sm:$0xff] %vm385_vm2, %v1511_v55  ;;  %3039 = vmatprep.mubr.msk.f32.mxu1 %vm517_vm4, %v1060_v57 }
 0x14c   : > { %1045 = vst.msk [vmem:[#allocation2 + $0x68] sm:$0xff] %vm482_vm3, %v1011_v36  ;;  %2161 = vrot.lane.b32.xlu1 %v3550_v61, %s3187_s28 }
 0x14d   : > { %1369 = vst.msk [vmem:[#allocation2 + $0x60] sm:$0xff] %vm189_vm0, %v3969_v58  ;;  %2067 = vrot.lane.b32.xlu0 %v3892_v33, %s3186_s23 }
 0x14e   : > { %v821_v51 = vpop.permute.xlu1 %820 }
 0x14f   : > { %v1605_v62 = vpop.permute.xlu0 %1604  ;;  %854 = vst.msk [vmem:[#allocation2 + $0x70] sm:$0xff] %vm286_vm1, %v821_v51 }
 0x150   : > { %1650 = vst.msk [vmem:[#allocation2 + $0x10] sm:$0xff] %vm482_vm3, %v1605_v62  ;;  %1624 = vrot.lane.b32.xlu1 %v2779_v25, %s3187_s28 }
 0x151   : > { %1530 = vrot.lane.b32.xlu0 %v3357_v24, %s3186_s23  ;;  %v2841_v24 = vld [vmem:[%s3242_s21 + $0x7a] sm:$0xff] }
 0x152   : > { %v823_v20 = vpop.permute.xlu1 %822 }
 0x153   : > { %v1607_v44 = vpop.permute.xlu0 %1606  ;;  %v1061_v61 = vld [vmem:[#allocation2 + $0x68] sm:$0xff]  ;;  %855 = vst.msk [vmem:[#allocation2 + $0x78] sm:$0xff] %vm286_vm1, %v823_v20 }
 0x154   : > { %1651 = vst.msk [vmem:[#allocation2 + $0x18] sm:$0xff] %vm482_vm3, %v1607_v44  ;;  %3040 = vmatmul.mubr.msk.f32.gmra.mxu1 %vm517_vm4, %v1061_v61  ;;  %1626 = vrot.lane.b32.xlu1 %v2780_v5, %s3187_s28 }
 0x155   : > { %1370 = vst.msk [vmem:[#allocation2 + $0x68] sm:$0xff] %vm189_vm0, %v3988_v27  ;;  %2163 = vrot.lane.b32.xlu0 %v3547_v60, %s3187_s28 }
 0x156   : > { %v1414_v7 = vpop.permute.xlu1 %1413 }
 0x157   : > { %v917_v12 = vpop.permute.xlu0 %916  ;;  %v1666_v45 = vld [vmem:[#allocation2 + $0x10] sm:$0xff]  ;;  %1457 = vst.msk [vmem:[#allocation2 + $0x20] sm:$0xff] %vm286_vm1, %v1414_v7 }
 0x158   : > { %950 = vst.msk [vmem:[#allocation2 + $0x70] sm:$0xff] %vm385_vm2, %v917_v12  ;;  %3052 = vmatprep.mubr.msk.f32.mxu0 %vm517_vm4, %v1666_v45  ;;  %1433 = vrot.lane.b32.xlu1 %v2779_v25, %s3185_s22 }
 0x159   : > { %1911 = vst.msk [vmem:[#allocation2 + $0x10] sm:$0xff] %vm189_vm0, %v3733_v59  ;;  %1973 = vrot.lane.b32.xlu0 %v2841_v24, %s3185_s22  ;;  %v4016_v59 = vld [vmem:[%s3242_s21 + $0xd9] sm:$0xff] }
 0x15a   : > { %v1013_v60 = vpop.permute.xlu1 %1012 }
 0x15b   : > { %v919_v18 = vpop.permute.xlu0 %918  ;;  %v1667_v11 = vld [vmem:[#allocation2 + $0x18] sm:$0xff]  ;;  %1046 = vst.msk [vmem:[#allocation2 + $0x70] sm:$0xff] %vm482_vm3, %v1013_v60 }
 0x15c   : > { %951 = vst.msk [vmem:[#allocation2 + $0x78] sm:$0xff] %vm385_vm2, %v919_v18  ;;  %3053 = vmatmul.mubr.msk.f32.gmra.mxu0 %vm517_vm4, %v1667_v11  ;;  %2069 = vrot.lane.b32.xlu1 %v3917_v9, %s3186_s23 }
 0x15d   : > { %1912 = vst.msk [vmem:[#allocation2 + $0x18] sm:$0xff] %vm189_vm0, %v3745_v26  ;;  %1975 = vrot.lane.b32.xlu0 %v2842_v30, %s3185_s22 }
 0x15e   : > { %v1513_v19 = vpop.permute.xlu1 %1512 }
 0x15f   : > { %v1416_v4 = vpop.permute.xlu0 %1415  ;;  %1556 = vst.msk [vmem:[#allocation2 + $0x20] sm:$0xff] %vm385_vm2, %v1513_v19 }
 0x160   : > { %1458 = vst.msk [vmem:[#allocation2 + $0x28] sm:$0xff] %vm286_vm1, %v1416_v4  ;;  %1532 = vrot.lane.b32.xlu1 %v4016_v59, %s3186_s23 }
 0x161   : > { %1435 = vrot.lane.b32.xlu0 %v2780_v5, %s3185_s22  ;;  %v2880_v5 = vld [vmem:[%s3242_s21 + $0xe2] sm:$0xff] }
 0x162   : > { %v1515_v26 = vpop.permute.xlu1 %1514  ;;  %v1062_v32 = vld [vmem:[#allocation2 + $0x70] sm:$0xff] }
 0x163   : > { %v1015_v14 = vpop.permute.xlu0 %1014  ;;  %1557 = vst.msk [vmem:[#allocation2 + $0x28] sm:$0xff] %vm385_vm2, %v1515_v26  ;;  %3042 = vmatprep.mubr.msk.f32.mxu1 %vm517_vm4, %v1062_v32 }
 0x164   : > { %1047 = vst.msk [vmem:[#allocation2 + $0x78] sm:$0xff] %vm482_vm3, %v1015_v14  ;;  %2165 = vrot.lane.b32.xlu1 %v3586_v37, %s3187_s28  ;;  %v2874_v37 = vld [vmem:[%s3242_s21 + $0x9a] sm:$0xff] }
 0x165   : > { %1371 = vst.msk [vmem:[#allocation2 + $0x70] sm:$0xff] %vm189_vm0, %v4024_v21  ;;  %2071 = vrot.lane.b32.xlu0 %v3936_v50, %s3186_s23 }
 0x166   : > { %v1611_v34 = vpop.permute.xlu1 %1610 }
 0x167   : > { %v1609_v35 = vpop.permute.xlu0 %1608  ;;  %1653 = vst.msk [vmem:[#allocation2 + $0x28] sm:$0xff] %vm482_vm3, %v1611_v34 }
 0x168   : > { %1652 = vst.msk [vmem:[#allocation2 + $0x20] sm:$0xff] %vm482_vm3, %v1609_v35  ;;  %1628 = vrot.lane.b32.xlu1 %v2781_v13, %s3187_s28 }
 0x169   : > { %1534 = vrot.lane.b32.xlu0 %v4037_v6, %s3186_s23 }
 0x16a   : > { %v1418_v29 = vpop.permute.xlu1 %1417 }
 0x16b   : > { %v1958_v46 = vpop.permute.xlu0 %1957  ;;  %v1063_v41 = vld [vmem:[#allocation2 + $0x78] sm:$0xff]  ;;  %1459 = vst.msk [vmem:[#allocation2 + $0x30] sm:$0xff] %vm286_vm1, %v1418_v29 }
 0x16c   : > { %2005 = vst.msk [vmem:[#allocation2] sm:$0xff] %vm286_vm1, %v1958_v46  ;;  %3043 = vmatmul.mubr.msk.f32.gmra.mxu1 %vm517_vm4, %v1063_v41  ;;  %1630 = vrot.lane.b32.xlu1 %v2782_v38, %s3187_s28 }
 0x16d   : > { %1372 = vst.msk [vmem:[#allocation2 + $0x78] sm:$0xff] %vm189_vm0, %v4047_v2  ;;  %2167 = vrot.lane.b32.xlu0 %v2874_v37, %s3187_s28 }
 0x16e   : > { %v2054_v47 = vpop.permute.xlu1 %2053  ;;  %v1669_v49 = vld [vmem:[#allocation2 + $0x28] sm:$0xff] }
 0x16f   : > { %v1960_v39 = vpop.permute.xlu0 %1959  ;;  %v1668_v42 = vld [vmem:[#allocation2 + $0x20] sm:$0xff]  ;;  %2101 = vst.msk [vmem:[#allocation2] sm:$0xff] %vm385_vm2, %v2054_v47 }
 0x170   : > { %2006 = vst.msk [vmem:[#allocation2 + $0x8] sm:$0xff] %vm286_vm1, %v1960_v39  ;;  %3055 = vmatprep.mubr.msk.f32.mxu0 %vm517_vm4, %v1668_v42  ;;  %1979 = vrot.lane.b32.xlu1 %v2874_v37, %s3185_s22 }
 0x171   : > { %1913 = vst.msk [vmem:[#allocation2 + $0x20] sm:$0xff] %vm189_vm0, %v3775_v0  ;;  %1914 = vst.msk [vmem:[#allocation2 + $0x28] sm:$0xff] %vm189_vm0, %v3787_v16  ;;  %1977 = vrot.lane.b32.xlu0 %v2843_v23, %s3185_s22  ;;  %3056 = vmatmul.mubr.msk.f32.gmra.mxu0 %vm517_vm4, %v1669_v49 }
 0x172   : > { %v1517_v10 = vpop.permute.xlu1 %1516 }
 0x173   : > { %v1420_v17 = vpop.permute.xlu0 %1419  ;;  %1558 = vst.msk [vmem:[#allocation2 + $0x30] sm:$0xff] %vm385_vm2, %v1517_v10 }
 0x174   : > { %1460 = vst.msk [vmem:[#allocation2 + $0x38] sm:$0xff] %vm286_vm1, %v1420_v17  ;;  %2075 = vrot.lane.b32.xlu1 %v3988_v27, %s3186_s23 }
 0x175   : > { %2073 = vrot.lane.b32.xlu0 %v3969_v58, %s3186_s23 }
 0x176   : > { %v2150_v0 = vpop.permute.xlu1 %2149 }
 0x177   : > { %v2056_v16 = vpop.permute.xlu0 %2055  ;;  %2197 = vst.msk [vmem:[#allocation2] sm:$0xff] %vm482_vm3, %v2150_v0 }
 0x178   : > { %2102 = vst.msk [vmem:[#allocation2 + $0x8] sm:$0xff] %vm385_vm2, %v2056_v16  ;;  %2171 = vrot.lane.b32.xlu1 %v3631_v56, %s3187_s28 }
 0x179   : > { %2169 = vrot.lane.b32.xlu0 %v3622_v54, %s3187_s28 }
 0x17a   : > { %v1613_v8 = vpop.permute.xlu1 %1612 }
 0x17b   : > { %v1519_v1 = vpop.permute.xlu0 %1518  ;;  %1654 = vst.msk [vmem:[#allocation2 + $0x30] sm:$0xff] %vm482_vm3, %v1613_v8 }
 0x17c   : > { %1559 = vst.msk [vmem:[#allocation2 + $0x38] sm:$0xff] %vm385_vm2, %v1519_v1  ;;  %1983 = vrot.lane.b32.xlu1 %v3631_v56, %s3185_s22 }
 0x17d   : > { %1981 = vrot.lane.b32.xlu0 %v2845_v22, %s3185_s22 }
 0x17e   : > { %v1615_v52 = vpop.permute.xlu1 %1614  ;;  %v2213_v15 = vld [vmem:[#allocation2] sm:$0xff] }
 0x17f   : > { %v2152_v54 = vpop.permute.xlu0 %2151  ;;  %1655 = vst.msk [vmem:[#allocation2 + $0x38] sm:$0xff] %vm482_vm3, %v1615_v52  ;;  %3077 = vmatprep.mubr.msk.f32.mxu1 %vm517_vm4, %v2213_v15 }
 0x180   : > { %2198 = vst.msk [vmem:[#allocation2 + $0x8] sm:$0xff] %vm482_vm3, %v2152_v54  ;;  %2079 = vrot.lane.b32.xlu1 %v4047_v2, %s3186_s23 }
 0x181   : > { %2077 = vrot.lane.b32.xlu0 %v4024_v21, %s3186_s23 }
 0x182   : > { %v1422_v3 = vpop.permute.xlu1 %1421  ;;  %v1670_v56 = vld [vmem:[#allocation2 + $0x30] sm:$0xff] }
 0x183   : > { %v1962_v48 = vpop.permute.xlu0 %1961  ;;  %1461 = vst.msk [vmem:[#allocation2 + $0x40] sm:$0xff] %vm286_vm1, %v1422_v3  ;;  %3058 = vmatprep.mubr.msk.f32.mxu0 %vm517_vm4, %v1670_v56 }
 0x184   : > { %2007 = vst.msk [vmem:[#allocation2 + $0x10] sm:$0xff] %vm286_vm1, %v1962_v48  ;;  %2175 = vrot.lane.b32.xlu1 %v3703_v43, %s3187_s28 }
 0x185   : > { %1915 = vst.msk [vmem:[#allocation2 + $0x30] sm:$0xff] %vm189_vm0, %v3823_v53  ;;  %2173 = vrot.lane.b32.xlu0 %v3688_v28, %s3187_s28 }
 0x186   : > { %v2058_v40 = vpop.permute.xlu1 %2057  ;;  %v1671_v36 = vld [vmem:[#allocation2 + $0x38] sm:$0xff] }
 0x187   : > { %v1964_v55 = vpop.permute.xlu0 %1963  ;;  %v2214_v57 = vld [vmem:[#allocation2 + $0x8] sm:$0xff]  ;;  %2103 = vst.msk [vmem:[#allocation2 + $0x10] sm:$0xff] %vm385_vm2, %v2058_v40  ;;  %3059 = vmatmul.mubr.msk.f32.gmra.mxu0 %vm517_vm4, %v1671_v36 }
 0x188   : > { %2008 = vst.msk [vmem:[#allocation2 + $0x18] sm:$0xff] %vm286_vm1, %v1964_v55  ;;  %3078 = vmatmul.mubr.msk.f32.vlgmr.msra.gmra.mxu1 %vm517_vm4, %v2214_v57  ;;  %1987 = vrot.lane.b32.xlu1 %v3703_v43, %s3185_s22 }
 0x189   : > { %1916 = vst.msk [vmem:[#allocation2 + $0x38] sm:$0xff] %vm189_vm0, %v3844_v63  ;;  %1985 = vrot.lane.b32.xlu0 %v3688_v28, %s3185_s22  ;;  %v2879_v63 = vld [vmem:[%s3242_s21 + $0xda] sm:$0xff] }
 0x18a   : > { %v1521_v53 = vpop.permute.xlu1 %1520 }
 0x18b   : > { %v1424_v25 = vpop.permute.xlu0 %1423  ;;  %1560 = vst.msk [vmem:[#allocation2 + $0x40] sm:$0xff] %vm385_vm2, %v1521_v53  ;;  %v2995_v28 = vpop.f32.mrf.mxu0 }
 0x18c   : > { %1462 = vst.msk [vmem:[#allocation2 + $0x48] sm:$0xff] %vm286_vm1, %v1424_v25  ;;  %2083 = vrot.lane.b32.xlu1 %v4037_v6, %s3186_s23 }
 0x18d   : > { %713 = vst.msk [vmem:[%s4116_s29 + $0x8] sm:$0xff] %vm711_vm5, %v2995_v28  ;;  %2081 = vrot.lane.b32.xlu0 %v4016_v59, %s3186_s23  ;;  %v632_v43 = vpop.f32.mrf.mxu0 }
 0x18e   : > { %712 = vst.msk [vmem:[%s4116_s29] sm:$0xff] %vm711_vm5, %v632_v43  ;;  %v2154_v51 = vpop.permute.xlu1 %2153 }
 0x18f   : > { %v2060_v62 = vpop.permute.xlu0 %2059  ;;  %2199 = vst.msk [vmem:[#allocation2 + $0x10] sm:$0xff] %vm482_vm3, %v2154_v51  ;;  %v2998_v20 = vpop.f32.mrf.mxu0 }
 0x190   : > { %2104 = vst.msk [vmem:[#allocation2 + $0x18] sm:$0xff] %vm385_vm2, %v2060_v62  ;;  %2179 = vrot.lane.b32.xlu1 %v2880_v5, %s3187_s28 }
 0x191   : > { %715 = vst.msk [vmem:[%s4116_s29 + $0x28] sm:$0xff] %vm711_vm5, %v2998_v20  ;;  %2177 = vrot.lane.b32.xlu0 %v2879_v63, %s3187_s28  ;;  %v642_v44 = vpop.f32.mrf.mxu0 }
 0x192   : > { %714 = vst.msk [vmem:[%s4116_s29 + $0x20] sm:$0xff] %vm711_vm5, %v642_v44  ;;  %v1617_v61 = vpop.permute.xlu1 %1616 }
 0x193   : > { %v1523_v24 = vpop.permute.xlu0 %1522  ;;  %1656 = vst.msk [vmem:[#allocation2 + $0x40] sm:$0xff] %vm482_vm3, %v1617_v61 }
 0x194   : > { %1561 = vst.msk [vmem:[#allocation2 + $0x48] sm:$0xff] %vm385_vm2, %v1523_v24  ;;  %v3001_v7 = vpop.f32.mrf.mxu0 }
 0x195   : > { %717 = vst.msk [vmem:[%s4116_s29 + $0x48] sm:$0xff] %vm711_vm5, %v3001_v7 }
 0x196   : > { %v652_v12 = vpop.f32.mrf.mxu0  ;;  %v1619_v45 = vpop.permute.xlu1 %1618  ;;  %v2215_v60 = vld [vmem:[#allocation2 + $0x10] sm:$0xff] }
 0x197   : > { %716 = vst.msk [vmem:[%s4116_s29 + $0x40] sm:$0xff] %vm711_vm5, %v652_v12  ;;  %v2156_v30 = vpop.permute.xlu0 %2155  ;;  %3080 = vmatprep.mubr.msk.f32.mxu1 %vm517_vm4, %v2215_v60 }
 0x198   : > { %1657 = vst.msk [vmem:[#allocation2 + $0x48] sm:$0xff] %vm482_vm3, %v1619_v45  ;;  %2200 = vst.msk [vmem:[#allocation2 + $0x18] sm:$0xff] %vm482_vm3, %v2156_v30 }
 0x19a   : > { %v1426_v18 = vpop.permute.xlu1 %1425  ;;  %v1672_v59 = vld [vmem:[#allocation2 + $0x40] sm:$0xff] }
 0x19b   : > { %v1966_v11 = vpop.permute.xlu0 %1965  ;;  %1463 = vst.msk [vmem:[#allocation2 + $0x50] sm:$0xff] %vm286_vm1, %v1426_v18  ;;  %3061 = vmatprep.mubr.msk.f32.mxu0 %vm517_vm4, %v1672_v59 }
 0x19c   : > { %2009 = vst.msk [vmem:[#allocation2 + $0x20] sm:$0xff] %vm286_vm1, %v1966_v11 }
 0x19d   : > { %1917 = vst.msk [vmem:[#allocation2 + $0x40] sm:$0xff] %vm189_vm0, %v3872_v31 }
 0x19e   : > { %v2062_v19 = vpop.permute.xlu1 %2061 }
 0x19f   : > { %v1968_v4 = vpop.permute.xlu0 %1967  ;;  %v1673_v26 = vld [vmem:[#allocation2 + $0x48] sm:$0xff]  ;;  %v2216_v14 = vld [vmem:[#allocation2 + $0x18] sm:$0xff]  ;;  %2105 = vst.msk [vmem:[#allocation2 + $0x20] sm:$0xff] %vm385_vm2, %v2062_v19  ;;  %v3023_v32 = vpop.f32.mrf.mxu1 }
 0x1a0   : > { %2010 = vst.msk [vmem:[#allocation2 + $0x28] sm:$0xff] %vm286_vm1, %v1968_v4  ;;  %3062 = vmatmul.mubr.msk.f32.gmra.mxu0 %vm517_vm4, %v1673_v26  ;;  %3081 = vmatmul.mubr.msk.f32.gmra.mxu1 %vm517_vm4, %v2216_v14 }
 0x1a1   : > { %1918 = vst.msk [vmem:[#allocation2 + $0x48] sm:$0xff] %vm189_vm0, %v3892_v33  ;;  %1278 = vrot.lane.b32.xlu1 %v3023_v32, %s3186_s23  ;;  %v1181_v31 = vpop.f32.mrf.mxu1 }
 0x1a2   : > { %v1525_v13 = vpop.permute.xlu1 %1524  ;;  %1276 = vrot.lane.b32.xlu0 %v1181_v31, %s3186_s23 }
 0x1a3   : > { %v1428_v6 = vpop.permute.xlu0 %1427  ;;  %1562 = vst.msk [vmem:[#allocation2 + $0x50] sm:$0xff] %vm385_vm2, %v1525_v13 }
 0x1a4   : > { %1464 = vst.msk [vmem:[#allocation2 + $0x58] sm:$0xff] %vm286_vm1, %v1428_v6  ;;  %v3004_v34 = vpop.f32.mrf.mxu0 }
 0x1a5   : > { %719 = vst.msk [vmem:[%s4116_s29 + $0x68] sm:$0xff] %vm711_vm5, %v3004_v34 }
 0x1a6   : > { %v662_v35 = vpop.f32.mrf.mxu0  ;;  %v2158_v38 = vpop.permute.xlu1 %2157 }
 0x1a7   : > { %718 = vst.msk [vmem:[%s4116_s29 + $0x60] sm:$0xff] %vm711_vm5, %v662_v35  ;;  %v2064_v37 = vpop.permute.xlu0 %2063 }
 0x1a8   : > { %2201 = vst.msk [vmem:[#allocation2 + $0x20] sm:$0xff] %vm482_vm3, %v2158_v38 }
 0x1a9   : > { %2106 = vst.msk [vmem:[#allocation2 + $0x28] sm:$0xff] %vm385_vm2, %v2064_v37 }
 0x1aa   : > { %v1621_v33 = vpop.permute.xlu1 %1620 }
 0x1ab   : > { %v1527_v29 = vpop.permute.xlu0 %1526  ;;  %1658 = vst.msk [vmem:[#allocation2 + $0x50] sm:$0xff] %vm482_vm3, %v1621_v33 }
 0x1ac   : > { %1563 = vst.msk [vmem:[#allocation2 + $0x58] sm:$0xff] %vm385_vm2, %v1527_v29 }
 0x1ae   : > { %v1623_v46 = vpop.permute.xlu1 %1622 }
 0x1af   : > { %v2160_v41 = vpop.permute.xlu0 %2159  ;;  %v2217_v23 = vld [vmem:[#allocation2 + $0x20] sm:$0xff]  ;;  %1659 = vst.msk [vmem:[#allocation2 + $0x58] sm:$0xff] %vm482_vm3, %v1623_v46  ;;  %v3026_v47 = vpop.f32.mrf.mxu1 }
 0x1b0   : > { %2202 = vst.msk [vmem:[#allocation2 + $0x28] sm:$0xff] %vm482_vm3, %v2160_v41  ;;  %3083 = vmatprep.mubr.msk.f32.mxu1 %vm517_vm4, %v2217_v23  ;;  %1282 = vrot.lane.b32.xlu1 %v3026_v47, %s3186_s23 }
 0x1b1   : > { %v1191_v39 = vpop.f32.mrf.mxu1 }
 0x1b2   : > { %v1430_v42 = vpop.permute.xlu1 %1429  ;;  %1280 = vrot.lane.b32.xlu0 %v1191_v39, %s3186_s23  ;;  %v1674_v10 = vld [vmem:[#allocation2 + $0x50] sm:$0xff] }
 0x1b3   : > { %v1970_v49 = vpop.permute.xlu0 %1969  ;;  %1465 = vst.msk [vmem:[#allocation2 + $0x60] sm:$0xff] %vm286_vm1, %v1430_v42  ;;  %3064 = vmatprep.mubr.msk.f32.mxu0 %vm517_vm4, %v1674_v10 }
 0x1b4   : > { %2011 = vst.msk [vmem:[#allocation2 + $0x30] sm:$0xff] %vm286_vm1, %v1970_v49  ;;  %v3007_v17 = vpop.f32.mrf.mxu0 }
 0x1b5   : > { %1919 = vst.msk [vmem:[#allocation2 + $0x50] sm:$0xff] %vm189_vm0, %v3917_v9 }
 0x1b6   : > { %721 = vst.msk [vmem:[%s4116_s29 + $0x88] sm:$0xff] %vm711_vm5, %v3007_v17  ;;  %v672_v0 = vpop.f32.mrf.mxu0  ;;  %v2066_v16 = vpop.permute.xlu1 %2065  ;;  %v1675_v8 = vld [vmem:[#allocation2 + $0x58] sm:$0xff] }
 0x1b7   : > { %720 = vst.msk [vmem:[%s4116_s29 + $0x80] sm:$0xff] %vm711_vm5, %v672_v0  ;;  %v1972_v22 = vpop.permute.xlu0 %1971  ;;  %v2218_v1 = vld [vmem:[#allocation2 + $0x28] sm:$0xff]  ;;  %3065 = vmatmul.mubr.msk.f32.gmra.mxu0 %vm517_vm4, %v1675_v8 }
 0x1b8   : > { %2107 = vst.msk [vmem:[#allocation2 + $0x30] sm:$0xff] %vm385_vm2, %v2066_v16  ;;  %3084 = vmatmul.mubr.msk.f32.gmra.mxu1 %vm517_vm4, %v2218_v1 }
 0x1b9   : > { %2012 = vst.msk [vmem:[#allocation2 + $0x38] sm:$0xff] %vm286_vm1, %v1972_v22 }
 0x1ba   : > { %1920 = vst.msk [vmem:[#allocation2 + $0x58] sm:$0xff] %vm189_vm0, %v3936_v50  ;;  %v1529_v9 = vpop.permute.xlu1 %1528 }
 0x1bb   : > { %v1432_v52 = vpop.permute.xlu0 %1431  ;;  %1564 = vst.msk [vmem:[#allocation2 + $0x60] sm:$0xff] %vm385_vm2, %v1529_v9 }
 0x1bc   : > { %1466 = vst.msk [vmem:[#allocation2 + $0x68] sm:$0xff] %vm286_vm1, %v1432_v52 }
 0x1be   : > { %v2162_v54 = vpop.permute.xlu1 %2161 }
 0x1bf   : > { %v2068_v15 = vpop.permute.xlu0 %2067  ;;  %2203 = vst.msk [vmem:[#allocation2 + $0x30] sm:$0xff] %vm482_vm3, %v2162_v54  ;;  %v3029_v3 = vpop.f32.mrf.mxu1 }
 0x1c0   : > { %2108 = vst.msk [vmem:[#allocation2 + $0x38] sm:$0xff] %vm385_vm2, %v2068_v15  ;;  %1286 = vrot.lane.b32.xlu1 %v3029_v3, %s3186_s23 }
 0x1c1   : > { %v1201_v48 = vpop.f32.mrf.mxu1 }
 0x1c2   : > { %v1625_v56 = vpop.permute.xlu1 %1624  ;;  %1284 = vrot.lane.b32.xlu0 %v1201_v48, %s3186_s23 }
 0x1c3   : > { %v1531_v50 = vpop.permute.xlu0 %1530  ;;  %1660 = vst.msk [vmem:[#allocation2 + $0x60] sm:$0xff] %vm482_vm3, %v1625_v56 }
 0x1c4   : > { %1565 = vst.msk [vmem:[#allocation2 + $0x68] sm:$0xff] %vm385_vm2, %v1531_v50  ;;  %v3010_v40 = vpop.f32.mrf.mxu0 }
 0x1c5   : > { %723 = vst.msk [vmem:[%s4116_s29 + $0xa8] sm:$0xff] %vm711_vm5, %v3010_v40 }
 0x1c6   : > { %v682_v55 = vpop.f32.mrf.mxu0  ;;  %v1627_v36 = vpop.permute.xlu1 %1626  ;;  %v2219_v53 = vld [vmem:[#allocation2 + $0x30] sm:$0xff] }
 0x1c7   : > { %722 = vst.msk [vmem:[%s4116_s29 + $0xa0] sm:$0xff] %vm711_vm5, %v682_v55  ;;  %v2164_v57 = vpop.permute.xlu0 %2163  ;;  %3086 = vmatprep.mubr.msk.f32.mxu1 %vm517_vm4, %v2219_v53 }
 0x1c8   : > { %1661 = vst.msk [vmem:[#allocation2 + $0x68] sm:$0xff] %vm482_vm3, %v1627_v36  ;;  %2204 = vst.msk [vmem:[#allocation2 + $0x38] sm:$0xff] %vm482_vm3, %v2164_v57 }
 0x1ca   : > { %v1434_v25 = vpop.permute.xlu1 %1433  ;;  %v1676_v43 = vld [vmem:[#allocation2 + $0x60] sm:$0xff] }
 0x1cb   : > { %v1974_v28 = vpop.permute.xlu0 %1973  ;;  %1467 = vst.msk [vmem:[#allocation2 + $0x70] sm:$0xff] %vm286_vm1, %v1434_v25  ;;  %3067 = vmatprep.mubr.msk.f32.mxu0 %vm517_vm4, %v1676_v43 }
 0x1cc   : > { %2013 = vst.msk [vmem:[#allocation2 + $0x40] sm:$0xff] %vm286_vm1, %v1974_v28 }
 0x1cd   : > { %1921 = vst.msk [vmem:[#allocation2 + $0x60] sm:$0xff] %vm189_vm0, %v3969_v58 }
 0x1ce   : > { %v2070_v63 = vpop.permute.xlu1 %2069 }
 0x1cf   : > { %v1976_v51 = vpop.permute.xlu0 %1975  ;;  %v1677_v62 = vld [vmem:[#allocation2 + $0x68] sm:$0xff]  ;;  %v2220_v5 = vld [vmem:[#allocation2 + $0x38] sm:$0xff]  ;;  %2109 = vst.msk [vmem:[#allocation2 + $0x40] sm:$0xff] %vm385_vm2, %v2070_v63 }
 0x1d0   : > { %2014 = vst.msk [vmem:[#allocation2 + $0x48] sm:$0xff] %vm286_vm1, %v1976_v51  ;;  %3068 = vmatmul.mubr.msk.f32.gmra.mxu0 %vm517_vm4, %v1677_v62  ;;  %3087 = vmatmul.mubr.msk.f32.gmra.mxu1 %vm517_vm4, %v2220_v5 }
 0x1d1   : > { %1922 = vst.msk [vmem:[#allocation2 + $0x68] sm:$0xff] %vm189_vm0, %v3988_v27 }
 0x1d2   : > { %v1533_v20 = vpop.permute.xlu1 %1532 }
 0x1d3   : > { %v1436_v44 = vpop.permute.xlu0 %1435  ;;  %1566 = vst.msk [vmem:[#allocation2 + $0x70] sm:$0xff] %vm385_vm2, %v1533_v20  ;;  %v3013_v58 = vpop.f32.mrf.mxu0 }
 0x1d4   : > { %1468 = vst.msk [vmem:[#allocation2 + $0x78] sm:$0xff] %vm286_vm1, %v1436_v44  ;;  %v3032_v61 = vpop.f32.mrf.mxu1 }
 0x1d5   : > { %725 = vst.msk [vmem:[%s4116_s29 + $0xc8] sm:$0xff] %vm711_vm5, %v3013_v58  ;;  %1290 = vrot.lane.b32.xlu1 %v3032_v61, %s3186_s23  ;;  %v692_v24 = vpop.f32.mrf.mxu0 }
 0x1d6   : > { %v1211_v7 = vpop.f32.mrf.mxu1  ;;  %724 = vst.msk [vmem:[%s4116_s29 + $0xc0] sm:$0xff] %vm711_vm5, %v692_v24  ;;  %v2166_v12 = vpop.permute.xlu1 %2165 }
 0x1d7   : > { %v2072_v45 = vpop.permute.xlu0 %2071  ;;  %1288 = vrot.lane.b32.xlu0 %v1211_v7, %s3186_s23  ;;  %2205 = vst.msk [vmem:[#allocation2 + $0x40] sm:$0xff] %vm482_vm3, %v2166_v12 }
 0x1d8   : > { %2110 = vst.msk [vmem:[#allocation2 + $0x48] sm:$0xff] %vm385_vm2, %v2072_v45 }
 0x1da   : > { %v1629_v27 = vpop.permute.xlu1 %1628 }
 0x1db   : > { %v1535_v30 = vpop.permute.xlu0 %1534  ;;  %1662 = vst.msk [vmem:[#allocation2 + $0x70] sm:$0xff] %vm482_vm3, %v1629_v27 }
 0x1dc   : > { %1567 = vst.msk [vmem:[#allocation2 + $0x78] sm:$0xff] %vm385_vm2, %v1535_v30 }
 0x1de   : > { %v1631_v60 = vpop.permute.xlu1 %1630  ;;  %v2221_v11 = vld [vmem:[#allocation2 + $0x40] sm:$0xff] }
 0x1df   : > { %v2168_v18 = vpop.permute.xlu0 %2167  ;;  %1663 = vst.msk [vmem:[#allocation2 + $0x78] sm:$0xff] %vm482_vm3, %v1631_v60  ;;  %3089 = vmatprep.mubr.msk.f32.mxu1 %vm517_vm4, %v2221_v11 }
 0x1e0   : > { %2206 = vst.msk [vmem:[#allocation2 + $0x48] sm:$0xff] %vm482_vm3, %v2168_v18 }
 0x1e2   : > { %v1678_v19 = vld [vmem:[#allocation2 + $0x70] sm:$0xff]  ;;  %v1980_v4 = vpop.permute.xlu1 %1979 }
 0x1e3   : > { %v1978_v59 = vpop.permute.xlu0 %1977  ;;  %3070 = vmatprep.mubr.msk.f32.mxu0 %vm517_vm4, %v1678_v19  ;;  %1923 = vst.msk [vmem:[#allocation2 + $0x70] sm:$0xff] %vm189_vm0, %v4024_v21 }
 0x1e4   : > { %2015 = vst.msk [vmem:[#allocation2 + $0x50] sm:$0xff] %vm286_vm1, %v1978_v59  ;;  %2016 = vst.msk [vmem:[#allocation2 + $0x58] sm:$0xff] %vm286_vm1, %v1980_v4 }
 0x1e6   : > { %v1679_v14 = vld [vmem:[#allocation2 + $0x78] sm:$0xff]  ;;  %v2076_v31 = vpop.permute.xlu1 %2075 }
 0x1e7   : > { %v2074_v26 = vpop.permute.xlu0 %2073  ;;  %v2222_v32 = vld [vmem:[#allocation2 + $0x48] sm:$0xff]  ;;  %v3016_v13 = vpop.f32.mrf.mxu0  ;;  %3071 = vmatmul.mubr.msk.f32.gmra.mxu0 %vm517_vm4, %v1679_v14  ;;  %1924 = vst.msk [vmem:[#allocation2 + $0x78] sm:$0xff] %vm189_vm0, %v4047_v2 }
 0x1e8   : > { %2111 = vst.msk [vmem:[#allocation2 + $0x50] sm:$0xff] %vm385_vm2, %v2074_v26  ;;  %3090 = vmatmul.mubr.msk.f32.gmra.mxu1 %vm517_vm4, %v2222_v32  ;;  %2112 = vst.msk [vmem:[#allocation2 + $0x58] sm:$0xff] %vm385_vm2, %v2076_v31  ;;  %v3035_v21 = vpop.f32.mrf.mxu1 }
 0x1e9   : > { %727 = vst.msk [vmem:[%s4116_s29 + $0xe8] sm:$0xff] %vm711_vm5, %v3016_v13  ;;  %1294 = vrot.lane.b32.xlu1 %v3035_v21, %s3186_s23  ;;  %v702_v6 = vpop.f32.mrf.mxu0 }
 0x1ea   : > { %726 = vst.msk [vmem:[%s4116_s29 + $0xe0] sm:$0xff] %vm711_vm5, %v702_v6  ;;  %v1221_v34 = vpop.f32.mrf.mxu1  ;;  %v2172_v38 = vpop.permute.xlu1 %2171 }
 0x1eb   : > { %v2170_v35 = vpop.permute.xlu0 %2169  ;;  %1292 = vrot.lane.b32.xlu0 %v1221_v34, %s3186_s23  ;;  %2208 = vst.msk [vmem:[#allocation2 + $0x58] sm:$0xff] %vm482_vm3, %v2172_v38 }
 0x1ec   : > { %2207 = vst.msk [vmem:[#allocation2 + $0x50] sm:$0xff] %vm482_vm3, %v2170_v35 }
 0x1ee   : > { %v1984_v37 = vpop.permute.xlu1 %1983 }
 0x1ef   : > { %v1982_v2 = vpop.permute.xlu0 %1981  ;;  %2018 = vst.msk [vmem:[#allocation2 + $0x68] sm:$0xff] %vm286_vm1, %v1984_v37 }
 0x1f0   : > { %2017 = vst.msk [vmem:[#allocation2 + $0x60] sm:$0xff] %vm286_vm1, %v1982_v2 }
 0x1f2   : > { %v2080_v46 = vpop.permute.xlu1 %2079  ;;  %v2224_v41 = vld [vmem:[#allocation2 + $0x58] sm:$0xff] }
 0x1f3   : > { %v2078_v33 = vpop.permute.xlu0 %2077  ;;  %v2223_v29 = vld [vmem:[#allocation2 + $0x50] sm:$0xff]  ;;  %2114 = vst.msk [vmem:[#allocation2 + $0x68] sm:$0xff] %vm385_vm2, %v2080_v46 }
 0x1f4   : > { %2113 = vst.msk [vmem:[#allocation2 + $0x60] sm:$0xff] %vm385_vm2, %v2078_v33  ;;  %3092 = vmatprep.mubr.msk.f32.mxu1 %vm517_vm4, %v2223_v29 }
 0x1f5   : > { %3093 = vmatmul.mubr.msk.f32.gmra.mxu1 %vm517_vm4, %v2224_v41 }
 0x1f6   : > { %v2176_v47 = vpop.permute.xlu1 %2175 }
 0x1f7   : > { %v2174_v23 = vpop.permute.xlu0 %2173  ;;  %2210 = vst.msk [vmem:[#allocation2 + $0x68] sm:$0xff] %vm482_vm3, %v2176_v47 }
 0x1f8   : > { %2209 = vst.msk [vmem:[#allocation2 + $0x60] sm:$0xff] %vm482_vm3, %v2174_v23 }
 0x1fa   : > { %v1988_v42 = vpop.permute.xlu1 %1987 }
 0x1fb   : > { %v1986_v39 = vpop.permute.xlu0 %1985  ;;  %2020 = vst.msk [vmem:[#allocation2 + $0x78] sm:$0xff] %vm286_vm1, %v1988_v42 }
 0x1fc   : > { %2019 = vst.msk [vmem:[#allocation2 + $0x70] sm:$0xff] %vm286_vm1, %v1986_v39  ;;  %v3038_v49 = vpop.f32.mrf.mxu1 }
 0x1fd   : > { %1298 = vrot.lane.b32.xlu1 %v3038_v49, %s3186_s23 }
 0x1fe   : > { %v1231_v10 = vpop.f32.mrf.mxu1  ;;  %v2084_v16 = vpop.permute.xlu1 %2083  ;;  %v2226_v22 = vld [vmem:[#allocation2 + $0x68] sm:$0xff] }
 0x1ff   : > { %v2082_v17 = vpop.permute.xlu0 %2081  ;;  %1296 = vrot.lane.b32.xlu0 %v1231_v10, %s3186_s23  ;;  %v2225_v0 = vld [vmem:[#allocation2 + $0x60] sm:$0xff]  ;;  %2116 = vst.msk [vmem:[#allocation2 + $0x78] sm:$0xff] %vm385_vm2, %v2084_v16 }
 0x200   : > { %2115 = vst.msk [vmem:[#allocation2 + $0x70] sm:$0xff] %vm385_vm2, %v2082_v17  ;;  %3095 = vmatprep.mubr.msk.f32.mxu1 %vm517_vm4, %v2225_v0 }
 0x201   : > { %3096 = vmatmul.mubr.msk.f32.gmra.mxu1 %vm517_vm4, %v2226_v22 }
 0x202   : > { %v2180_v1 = vpop.permute.xlu1 %2179 }
 0x203   : > { %v2178_v8 = vpop.permute.xlu0 %2177  ;;  %2212 = vst.msk [vmem:[#allocation2 + $0x78] sm:$0xff] %vm482_vm3, %v2180_v1 }
 0x204   : > { %2211 = vst.msk [vmem:[#allocation2 + $0x70] sm:$0xff] %vm482_vm3, %v2178_v8  ;;  %v3051_v9 = vpop.f32.mrf.mxu0 }
 0x205   : > { %2802 = vst.msk [vmem:[%s4116_s29 + $0x18] sm:$0xff] %vm711_vm5, %v3051_v9 }
 0x206   : > { %v1797_v52 = vpop.f32.mrf.mxu0 }
 0x207   : > { %2801 = vst.msk [vmem:[%s4116_s29 + $0x10] sm:$0xff] %vm711_vm5, %v1797_v52 }
 0x20a   : > { %v2228_v15 = vld [vmem:[#allocation2 + $0x78] sm:$0xff] }
 0x20b   : > { %v2227_v54 = vld [vmem:[#allocation2 + $0x70] sm:$0xff] }
 0x20c   : > { %3098 = vmatprep.mubr.msk.f32.mxu1 %vm517_vm4, %v2227_v54 }
 0x20d   : > { %3099 = vmatmul.mubr.msk.f32.gmra.mxu1 %vm517_vm4, %v2228_v15 }
 0x213   : > { %v1279_v3 = vpop.permute.xlu1 %1278 }
 0x214   : > { %1326 = vst.msk [vmem:[%s4116_s29 + $0x8] sm:$0xff] %vm1324_vm6, %v1279_v3  ;;  %v3041_v48 = vpop.f32.mrf.mxu1  ;;  %v1277_v56 = vpop.permute.xlu0 %1276 }
 0x215   : > { %1302 = vrot.lane.b32.xlu1 %v3041_v48, %s3186_s23  ;;  %1325 = vst.msk [vmem:[%s4116_s29] sm:$0xff] %vm1324_vm6, %v1277_v56 }
 0x216   : > { %v1241_v50 = vpop.f32.mrf.mxu1 }
 0x217   : > { %1300 = vrot.lane.b32.xlu0 %v1241_v50, %s3186_s23 }
 0x21c   : > { %v3054_v40 = vpop.f32.mrf.mxu0 }
 0x21d   : > { %2804 = vst.msk [vmem:[%s4116_s29 + $0x38] sm:$0xff] %vm711_vm5, %v3054_v40 }
 0x21e   : > { %v1807_v55 = vpop.f32.mrf.mxu0 }
 0x21f   : > { %2803 = vst.msk [vmem:[%s4116_s29 + $0x30] sm:$0xff] %vm711_vm5, %v1807_v55 }
 0x222   : > { %v1283_v36 = vpop.permute.xlu1 %1282 }
 0x223   : > { %1328 = vst.msk [vmem:[%s4116_s29 + $0x28] sm:$0xff] %vm1324_vm6, %v1283_v36 }
 0x224   : > { %v1281_v57 = vpop.permute.xlu0 %1280 }
 0x225   : > { %1327 = vst.msk [vmem:[%s4116_s29 + $0x20] sm:$0xff] %vm1324_vm6, %v1281_v57 }
 0x22c   : > { %v3044_v53 = vpop.f32.mrf.mxu1 }
 0x22d   : > { %1306 = vrot.lane.b32.xlu1 %v3044_v53, %s3186_s23 }
 0x22e   : > { %v1251_v25 = vpop.f32.mrf.mxu1 }
 0x22f   : > { %1304 = vrot.lane.b32.xlu0 %v1251_v25, %s3186_s23 }
 0x231   : > { %v3057_v28 = vpop.f32.mrf.mxu0 }
 0x232   : > { %2806 = vst.msk [vmem:[%s4116_s29 + $0x58] sm:$0xff] %vm711_vm5, %v3057_v28  ;;  %v1287_v63 = vpop.permute.xlu1 %1286 }
 0x233   : > { %v1817_v43 = vpop.f32.mrf.mxu0  ;;  %1330 = vst.msk [vmem:[%s4116_s29 + $0x48] sm:$0xff] %vm1324_vm6, %v1287_v63 }
 0x234   : > { %2805 = vst.msk [vmem:[%s4116_s29 + $0x50] sm:$0xff] %vm711_vm5, %v1817_v43  ;;  %v1285_v51 = vpop.permute.xlu0 %1284 }
 0x235   : > { %1329 = vst.msk [vmem:[%s4116_s29 + $0x40] sm:$0xff] %vm1324_vm6, %v1285_v51 }
 0x247   : > { %v1291_v62 = vpop.permute.xlu1 %1290  ;;  %v3060_v5 = vpop.f32.mrf.mxu0 }
 0x248   : > { %1332 = vst.msk [vmem:[%s4116_s29 + $0x68] sm:$0xff] %vm1324_vm6, %v1291_v62  ;;  %v3079_v20 = vpop.f32.mrf.mxu1 }
 0x249   : > { %2808 = vst.msk [vmem:[%s4116_s29 + $0x78] sm:$0xff] %vm711_vm5, %v3060_v5  ;;  %v1289_v44 = vpop.permute.xlu0 %1288  ;;  %2443 = vrot.lane.b32.xlu1 %v3079_v20, %s3186_s23  ;;  %v1827_v58 = vpop.f32.mrf.mxu0 }
 0x24a   : > { %1331 = vst.msk [vmem:[%s4116_s29 + $0x60] sm:$0xff] %vm1324_vm6, %v1289_v44  ;;  %v2346_v61 = vpop.f32.mrf.mxu1 }
 0x24b   : > { %2807 = vst.msk [vmem:[%s4116_s29 + $0x70] sm:$0xff] %vm711_vm5, %v1827_v58  ;;  %2441 = vrot.lane.b32.xlu0 %v2346_v61, %s3186_s23 }
 0x25b   : > { %v1295_v24 = vpop.permute.xlu1 %1294 }
 0x25c   : > { %1334 = vst.msk [vmem:[%s4116_s29 + $0x88] sm:$0xff] %vm1324_vm6, %v1295_v24 }
 0x25d   : > { %v1293_v7 = vpop.permute.xlu0 %1292 }
 0x25e   : > { %1333 = vst.msk [vmem:[%s4116_s29 + $0x80] sm:$0xff] %vm1324_vm6, %v1293_v7 }
 0x260   : > { %v3063_v12 = vpop.f32.mrf.mxu0  ;;  %v3082_v45 = vpop.f32.mrf.mxu1 }
 0x261   : > { %2810 = vst.msk [vmem:[%s4116_s29 + $0x98] sm:$0xff] %vm711_vm5, %v3063_v12  ;;  %2447 = vrot.lane.b32.xlu1 %v3082_v45, %s3186_s23 }
 0x262   : > { %v1837_v27 = vpop.f32.mrf.mxu0  ;;  %v2356_v30 = vpop.f32.mrf.mxu1 }
 0x263   : > { %2809 = vst.msk [vmem:[%s4116_s29 + $0x90] sm:$0xff] %vm711_vm5, %v1837_v27  ;;  %2445 = vrot.lane.b32.xlu0 %v2356_v30, %s3186_s23 }
 0x26f   : > { %v1299_v60 = vpop.permute.xlu1 %1298 }
 0x270   : > { %1336 = vst.msk [vmem:[%s4116_s29 + $0xa8] sm:$0xff] %vm1324_vm6, %v1299_v60 }
 0x271   : > { %v1297_v18 = vpop.permute.xlu0 %1296 }
 0x272   : > { %1335 = vst.msk [vmem:[%s4116_s29 + $0xa0] sm:$0xff] %vm1324_vm6, %v1297_v18 }
 0x277   : > { %v3066_v11 = vpop.f32.mrf.mxu0 }
 0x278   : > { %v3085_v59 = vpop.f32.mrf.mxu1  ;;  %2812 = vst.msk [vmem:[%s4116_s29 + $0xb8] sm:$0xff] %vm711_vm5, %v3066_v11 }
 0x279   : > { %2451 = vrot.lane.b32.xlu1 %v3085_v59, %s3186_s23  ;;  %v1847_v19 = vpop.f32.mrf.mxu0 }
 0x27a   : > { %v2366_v4 = vpop.f32.mrf.mxu1  ;;  %2811 = vst.msk [vmem:[%s4116_s29 + $0xb0] sm:$0xff] %vm711_vm5, %v1847_v19 }
 0x27b   : > { %2449 = vrot.lane.b32.xlu0 %v2366_v4, %s3186_s23 }
 0x287   : > { %v1303_v26 = vpop.permute.xlu1 %1302 }
 0x288   : > { %1338 = vst.msk [vmem:[%s4116_s29 + $0xc8] sm:$0xff] %vm1324_vm6, %v1303_v26 }
 0x289   : > { %v1301_v14 = vpop.permute.xlu0 %1300 }
 0x28a   : > { %1337 = vst.msk [vmem:[%s4116_s29 + $0xc0] sm:$0xff] %vm1324_vm6, %v1301_v14 }
 0x290   : > { %v3069_v32 = vpop.f32.mrf.mxu0  ;;  %v3088_v31 = vpop.f32.mrf.mxu1 }
 0x291   : > { %2814 = vst.msk [vmem:[%s4116_s29 + $0xd8] sm:$0xff] %vm711_vm5, %v3069_v32  ;;  %2455 = vrot.lane.b32.xlu1 %v3088_v31, %s3186_s23 }
 0x292   : > { %v1857_v13 = vpop.f32.mrf.mxu0  ;;  %v2376_v21 = vpop.f32.mrf.mxu1 }
 0x293   : > { %2813 = vst.msk [vmem:[%s4116_s29 + $0xd0] sm:$0xff] %vm711_vm5, %v1857_v13  ;;  %2453 = vrot.lane.b32.xlu0 %v2376_v21, %s3186_s23 }
 0x29f   : > { %v1307_v6 = vpop.permute.xlu1 %1306 }
 0x2a0   : > { %1340 = vst.msk [vmem:[%s4116_s29 + $0xe8] sm:$0xff] %vm1324_vm6, %v1307_v6 }
 0x2a1   : > { %v1305_v34 = vpop.permute.xlu0 %1304 }
 0x2a2   : > { %1339 = vst.msk [vmem:[%s4116_s29 + $0xe0] sm:$0xff] %vm1324_vm6, %v1305_v34 }
 0x2a7   : > { %v3072_v35 = vpop.f32.mrf.mxu0 }
 0x2a8   : > { %v3091_v38 = vpop.f32.mrf.mxu1  ;;  %2816 = vst.msk [vmem:[%s4116_s29 + $0xf8] sm:$0xff] %vm711_vm5, %v3072_v35 }
 0x2a9   : > { %2459 = vrot.lane.b32.xlu1 %v3091_v38, %s3186_s23  ;;  %v1867_v2 = vpop.f32.mrf.mxu0 }
 0x2aa   : > { %v2386_v37 = vpop.f32.mrf.mxu1  ;;  %2815 = vst.msk [vmem:[%s4116_s29 + $0xf0] sm:$0xff] %vm711_vm5, %v1867_v2 }
 0x2ab   : > { %2457 = vrot.lane.b32.xlu0 %v2386_v37, %s3186_s23 }
 0x2b5   : > { %v3094_v33 = vpop.f32.mrf.mxu1 }
 0x2b6   : > { %2463 = vrot.lane.b32.xlu1 %v3094_v33, %s3186_s23 }
 0x2b7   : > { %v2396_v29 = vpop.f32.mrf.mxu1 }
 0x2b8   : > { %2461 = vrot.lane.b32.xlu0 %v2396_v29, %s3186_s23 }
 0x2bb   : > { %v2444_v46 = vpop.permute.xlu1 %2443 }
 0x2bc   : > { %2900 = vst.msk [vmem:[%s4116_s29 + $0x18] sm:$0xff] %vm1324_vm6, %v2444_v46 }
 0x2bd   : > { %v2442_v41 = vpop.permute.xlu0 %2441 }
 0x2be   : > { %2899 = vst.msk [vmem:[%s4116_s29 + $0x10] sm:$0xff] %vm1324_vm6, %v2442_v41 }
 0x2c1   : > { %v3097_v23 = vpop.f32.mrf.mxu1 }
 0x2c2   : > { %2467 = vrot.lane.b32.xlu1 %v3097_v23, %s3186_s23 }
 0x2c3   : > { %v2406_v47 = vpop.f32.mrf.mxu1 }
 0x2c4   : > { %2465 = vrot.lane.b32.xlu0 %v2406_v47, %s3186_s23 }
 0x2cd   : > { %v3100_v39 = vpop.f32.mrf.mxu1 }
 0x2ce   : > { %2471 = vrot.lane.b32.xlu1 %v3100_v39, %s3186_s23 }
 0x2cf   : > { %v2416_v42 = vpop.f32.mrf.mxu1 }
 0x2d0   : > { %2469 = vrot.lane.b32.xlu0 %v2416_v42, %s3186_s23 }
 0x2d3   : > { %v2448_v49 = vpop.permute.xlu1 %2447 }
 0x2d4   : > { %2902 = vst.msk [vmem:[%s4116_s29 + $0x38] sm:$0xff] %vm1324_vm6, %v2448_v49 }
 0x2d5   : > { %v2446_v10 = vpop.permute.xlu0 %2445 }
 0x2d6   : > { %2901 = vst.msk [vmem:[%s4116_s29 + $0x30] sm:$0xff] %vm1324_vm6, %v2446_v10 }
 0x2eb   : > { %v2452_v17 = vpop.permute.xlu1 %2451 }
 0x2ec   : > { %2904 = vst.msk [vmem:[%s4116_s29 + $0x58] sm:$0xff] %vm1324_vm6, %v2452_v17 }
 0x2ed   : > { %v2450_v0 = vpop.permute.xlu0 %2449 }
 0x2ee   : > { %2903 = vst.msk [vmem:[%s4116_s29 + $0x50] sm:$0xff] %vm1324_vm6, %v2450_v0 }
 0x303   : > { %v2456_v16 = vpop.permute.xlu1 %2455 }
 0x304   : > { %2906 = vst.msk [vmem:[%s4116_s29 + $0x78] sm:$0xff] %vm1324_vm6, %v2456_v16 }
 0x305   : > { %v2454_v22 = vpop.permute.xlu0 %2453 }
 0x306   : > { %2905 = vst.msk [vmem:[%s4116_s29 + $0x70] sm:$0xff] %vm1324_vm6, %v2454_v22 }
 0x31b   : > { %v2460_v8 = vpop.permute.xlu1 %2459 }
 0x31c   : > { %2908 = vst.msk [vmem:[%s4116_s29 + $0x98] sm:$0xff] %vm1324_vm6, %v2460_v8 }
 0x31d   : > { %v2458_v1 = vpop.permute.xlu0 %2457 }
 0x31e   : > { %2907 = vst.msk [vmem:[%s4116_s29 + $0x90] sm:$0xff] %vm1324_vm6, %v2458_v1 }
 0x328   : > { %v2464_v9 = vpop.permute.xlu1 %2463 }
 0x329   : > { %2910 = vst.msk [vmem:[%s4116_s29 + $0xb8] sm:$0xff] %vm1324_vm6, %v2464_v9 }
 0x32a   : > { %v2462_v52 = vpop.permute.xlu0 %2461 }
 0x32b   : > { %2909 = vst.msk [vmem:[%s4116_s29 + $0xb0] sm:$0xff] %vm1324_vm6, %v2462_v52 }
 0x334   : > { %v2468_v54 = vpop.permute.xlu1 %2467 }
 0x335   : > { %2912 = vst.msk [vmem:[%s4116_s29 + $0xd8] sm:$0xff] %vm1324_vm6, %v2468_v54 }
 0x336   : > { %v2466_v15 = vpop.permute.xlu0 %2465 }
 0x337   : > { %2911 = vst.msk [vmem:[%s4116_s29 + $0xd0] sm:$0xff] %vm1324_vm6, %v2466_v15 }
 0x340   : > { %v2472_v3 = vpop.permute.xlu1 %2471 }
 0x341   : > { %2914 = vst.msk [vmem:[%s4116_s29 + $0xf8] sm:$0xff] %vm1324_vm6, %v2472_v3 }
 0x342   : > { %v2470_v48 = vpop.permute.xlu0 %2469 }
 0x343   : > { %2913 = vst.msk [vmem:[%s4116_s29 + $0xf0] sm:$0xff] %vm1324_vm6, %v2470_v48 }
 0x344 PF: > { %s12_s13 = sadd.s32 1, %s3183_s13   ;;  %s4404_s9 = smov %s3175_s11 }
 0x345   : > { %p9_p7 = scmp.ge.s32.totalorder %s12_s13, 6   ;;  %s4405_s10 = smov %s3179_s12 }
 0x346   : > { %s4406_s11 = smov %s4409_s14  ;;  %s4407_s12 = smov %s4413_s15 }
 0x347   :  { %11 = sbr.rel (!%p9_p7) target bundleno = 3 (0x3), region = 65 }

</bundles_post_ra>
